<compile_context>
chip_gen: v5e
topology: v5e:2x2
jax: 0.10.0
libtpu: 0.0.40
codegen_flags: <defaults>
</compile_context>

<pallas_src>
import numpy as np

import jax
import jax.numpy as jnp
from jax import lax
from jax.experimental import pallas as pl
from jax.experimental.pallas import tpu as pltpu  # noqa: F401  (not required at these sizes)


def _full_spec(shape):
    # whole-array block for the grid=() fused call
    return pl.BlockSpec(shape, lambda: tuple(0 for _ in shape))


# ---------------------------------------------------------------------------
# The single fused kernel: conv1+ReLU+pool1+conv2+ReLU+pool2+fc1+fc2+fc3+slice+mean
# ---------------------------------------------------------------------------
def _fused_kernel(x_ref, w1b_ref, b1_ref, pr1_ref, pc1_ref,
                  w2b_ref, b2_ref, pr2_ref, pc2_ref,
                  fw1_ref, fb1_ref, fw2_ref, fb2_ref, fw3_ref, fb3_ref,
                  o_ref):
    f32 = jnp.float32

    # ---- conv1 (5x5 VALID, 3->6) as 5 banded GEMMs over row offsets ----------
    # x_ref: (32, 96) flat (i, j*3+c); w1b_ref: (5, 96, 168); out col = oj*6+co
    acc1 = jnp.zeros((28, 168), f32)
    for di in range(5):
        acc1 = acc1 + jnp.dot(x_ref[di:di + 28, :], w1b_ref[di],
                              preferred_element_type=f32)
    h1 = jnp.maximum(acc1 + b1_ref[...], 0.0)                         # ReLU

    # ---- pool1: AvgPool2d(2,2,pad=1,count_include_pad) as two matmuls --------
    p1 = jnp.dot(pr1_ref[...], h1, preferred_element_type=f32)        # (15, 168)
    p1 = jnp.dot(p1, pc1_ref[...], preferred_element_type=f32)        # (15, 90)

    # ---- conv2 (5x5 VALID, 6->16) --------------------------------------------
    acc2 = jnp.zeros((11, 176), f32)
    for di in range(5):
        acc2 = acc2 + jnp.dot(p1[di:di + 11, :], w2b_ref[di],
                              preferred_element_type=f32)
    h2 = jnp.maximum(acc2 + b2_ref[...], 0.0)

    # ---- pool2 ----------------------------------------------------------------
    p2 = jnp.dot(pr2_ref[...], h2, preferred_element_type=f32)        # (6, 176)
    p2 = jnp.dot(p2, pc2_ref[...], preferred_element_type=f32)        # (6, 96)

    # ---- fc1 + ReLU (NCHW flatten folded into the per-row weight slabs) -------
    a1 = fb1_ref[...]                                                 # (1, 120)
    for oi in range(6):
        a1 = a1 + jnp.dot(p2[oi:oi + 1, :], fw1_ref[oi],
                          preferred_element_type=f32)
    a1 = jnp.maximum(a1, 0.0)

    # ---- fc2 + ReLU, fc3 -------------------------------------------------------
    a2 = jnp.dot(a1, fw2_ref[...], preferred_element_type=f32) + fb2_ref[...]
    a2 = jnp.maximum(a2, 0.0)
    y = jnp.dot(a2, fw3_ref[...], preferred_element_type=f32) + fb3_ref[...]  # (1, 10)

    # ---- x[0, 0:-1:2].mean(): logits 0,2,4,6,8 -> masked VPU lane reduce -------
    n_out = y.shape[1]
    n_keep = len(range(0, n_out - 1, 2))                              # 5
    col = lax.broadcasted_iota(jnp.int32, y.shape, 1)
    mask = jnp.logical_and(col < (n_out - 1), (col & 1) == 0)
    sel = jnp.where(mask, y, 0.0)
    o_ref[...] = (jnp.sum(sel, axis=1, keepdims=True) * (1.0 / n_keep)).astype(o_ref.dtype)


def _fused_call(x_flat, kparams):
    args = (x_flat,) + tuple(kparams)
    return pl.pallas_call(
        _fused_kernel,
        out_shape=jax.ShapeDtypeStruct((1, 1), jnp.float32),
        grid=(),
        in_specs=[_full_spec(a.shape) for a in args],
        out_specs=_full_spec((1, 1)),
    )(*args)


# ---------------------------------------------------------------------------
# Host-side, one-time weight preprocessing (pure layout plumbing, numpy).
# ---------------------------------------------------------------------------
def _pool_matrix(n_in, n_out):
    """P[o, i] = 0.5 if input row i lies in pooling window o (pad=1, k=2, s=2)."""
    p = np.zeros((n_out, n_in), np.float32)
    for o in range(n_out):
        for r in (2 * o - 1, 2 * o):
            if 0 <= r < n_in:
                p[o, r] = 0.5
    return p


def _band_weights(w_oihw, w_in, ow):
    """Banded (block-Toeplitz) weights so conv = sum_di x_flat[di:di+OH,:] @ band[di]."""
    cout, cin, kh, kw = w_oihw.shape
    wt = np.transpose(w_oihw, (2, 3, 1, 0))                   # (kh, kw, cin, cout)
    band = np.zeros((kh, w_in * cin, ow * cout), np.float32)
    for dj in range(kw):
        for oj in range(ow):
            r0 = (dj + oj) * cin
            band[:, r0:r0 + cin, oj * cout:(oj + 1) * cout] = wt[:, dj]
    return band


def prepare_params(params):
    """Convert torch-layout parameters into kernel-ready constant matrices (once)."""
    cw1, cb1, cw2, cb2, fw1, fb1, fw2, fb2, fw3, fb3 = [
        np.asarray(p, np.float32) for p in params]

    w1b = _band_weights(cw1, 32, 28)                                   # (5, 96, 168)
    b1t = np.tile(cb1, 28)[None, :]                                    # (1, 168)
    pr1 = _pool_matrix(28, 15)                                         # (15, 28)
    pc1 = np.kron(_pool_matrix(28, 15).T, np.eye(6, dtype=np.float32))  # (168, 90)

    w2b = _band_weights(cw2, 15, 11)                                   # (5, 90, 176)
    b2t = np.tile(cb2, 11)[None, :]                                    # (1, 176)
    pr2 = _pool_matrix(11, 6)                                          # (6, 11)
    pc2 = np.kron(_pool_matrix(11, 6).T, np.eye(16, dtype=np.float32))  # (176, 96)

    # fc1 weight permuted from torch flatten order (c*36+oi*6+oj) to the kernel's
    # pooled-map layout (row oi, col oj*16+c), pre-split into one slab per row oi.
    fw1p = np.transpose(fw1.reshape(120, 16, 6, 6), (2, 3, 1, 0)).reshape(6, 96, 120)

    kp = (w1b, b1t, pr1, pc1, w2b, b2t, pr2, pc2,
          fw1p, fb1[None, :], fw2.T.copy(), fb2[None, :], fw3.T.copy(), fb3[None, :])
    return tuple(jnp.asarray(a) for a in kp)


# ---------------------------------------------------------------------------
# Forward wrapper.
# ---------------------------------------------------------------------------
def cnn_invalid_forward(x_nchw, kparams):
    # Output = mean(fc3(...)[0, 0:-1:2]) depends only on sample 0 -> slice batch.
    x0 = x_nchw[0]                                                     # (3, 32, 32)
    x_flat = jnp.transpose(x0, (1, 2, 0)).reshape(32, 32 * 3)          # (H, W*C) flat
    out = _fused_call(x_flat.astype(jnp.float32), kparams)
    return out[0, 0]


# ---------------------------------------------------------------------------
# Pure-JAX reference + deterministic init (torch-default uniform ±1/sqrt(fan_in)).
# ---------------------------------------------------------------------------
def _avgpool_ref(x_nchw):
    s = lax.reduce_window(x_nchw, 0.0, lax.add, (1, 1, 2, 2), (1, 1, 2, 2),
                          [(0, 0), (0, 0), (1, 1), (1, 1)])
    return s * 0.25


def reference_forward(x_nchw, params):
    (cw1, cb1, cw2, cb2, fw1, fb1, fw2, fb2, fw3, fb3) = params
    dn = ("NCHW", "OIHW", "NCHW")
    y = lax.conv_general_dilated(x_nchw, cw1, (1, 1), "VALID", dimension_numbers=dn)
    y = _avgpool_ref(jnp.maximum(y + cb1[None, :, None, None], 0.0))
    y = lax.conv_general_dilated(y, cw2, (1, 1), "VALID", dimension_numbers=dn)
    y = _avgpool_ref(jnp.maximum(y + cb2[None, :, None, None], 0.0))
    y = y.reshape(y.shape[0], -1)
    y = jnp.maximum(y @ fw1.T + fb1, 0.0)
    y = jnp.maximum(y @ fw2.T + fb2, 0.0)
    y = y @ fw3.T + fb3
    return jnp.mean(y[0, 0:-1:2])


def init_params(key):
    def uniform(k, shape, fan_in):
        lim = 1.0 / jnp.sqrt(jnp.float32(fan_in))
        return jax.random.uniform(k, shape, jnp.float32, -lim, lim)

    ks = jax.random.split(key, 10)
    cw1 = uniform(ks[0], (6, 3, 5, 5), 75)
    cb1 = uniform(ks[1], (6,), 75)
    cw2 = uniform(ks[2], (16, 6, 5, 5), 150)
    cb2 = uniform(ks[3], (16,), 150)
    fw1 = uniform(ks[4], (120, 576), 576)
    fb1 = uniform(ks[5], (120,), 576)
    fw2 = uniform(ks[6], (84, 120), 120)
    fb2 = uniform(ks[7], (84,), 120)
    fw3 = uniform(ks[8], (10, 84), 84)
    fb3 = uniform(ks[9], (10,), 84)
    return (cw1, cb1, cw2, cb2, fw1, fb1, fw2, fb2, fw3, fb3)


if __name__ == "__main__":
    key = jax.random.PRNGKey(0)
    k_x, k_p = jax.random.split(key)
    batch = 2
    # 32x32 input is required so that flatten -> 16*6*6 = 576 matches fc1.
    x = jax.random.normal(k_x, (batch, 3, 32, 32), jnp.float32)
    params = init_params(k_p)

    kparams = prepare_params(params)            # one-time host-side weight plumbing
    fwd = jax.jit(cnn_invalid_forward)
    y = jax.block_until_ready(fwd(x, kparams))

    y_ref = reference_forward(x, params)
    assert y.shape == ()
    assert jnp.allclose(y, y_ref, atol=1e-4, rtol=1e-4), (y, y_ref)
    print("KERNEL_OK")
</pallas_src>

<mosaic_0001>
module attributes {stable_mosaic.version = 11 : i64} {
  func.func @_fused_kernel(%arg0: memref<32x96xf32, #tpu.memory_space<vmem>>, %arg1: memref<5x96x168xf32, #tpu.memory_space<vmem>>, %arg2: memref<1x168xf32, #tpu.memory_space<vmem>>, %arg3: memref<15x28xf32, #tpu.memory_space<vmem>>, %arg4: memref<168x90xf32, #tpu.memory_space<vmem>>, %arg5: memref<5x90x176xf32, #tpu.memory_space<vmem>>, %arg6: memref<1x176xf32, #tpu.memory_space<vmem>>, %arg7: memref<6x11xf32, #tpu.memory_space<vmem>>, %arg8: memref<176x96xf32, #tpu.memory_space<vmem>>, %arg9: memref<6x96x120xf32, #tpu.memory_space<vmem>>, %arg10: memref<1x120xf32, #tpu.memory_space<vmem>>, %arg11: memref<120x84xf32, #tpu.memory_space<vmem>>, %arg12: memref<1x84xf32, #tpu.memory_space<vmem>>, %arg13: memref<84x10xf32, #tpu.memory_space<vmem>>, %arg14: memref<1x10xf32, #tpu.memory_space<vmem>>, %arg15: memref<1x1xf32, #tpu.memory_space<vmem>>) attributes {dimension_semantics = [], scalar_prefetch = 0 : i64, scratch_operands = 0 : i64, tpu.core_type = #tpu.core_type<tc>} {
    %cst = arith.constant 0.000000e+00 : f32
    %0 = vector.broadcast %cst : f32 to vector<28x168xf32>
    %c0 = arith.constant 0 : index
    %c0_0 = arith.constant 0 : index
    %1 = vector.load %arg0[%c0, %c0_0] : memref<32x96xf32, #tpu.memory_space<vmem>>, vector<28x96xf32>
    %c0_1 = arith.constant 0 : index
    %c0_2 = arith.constant 0 : index
    %c0_3 = arith.constant 0 : index
    %2 = vector.load %arg1[%c0_1, %c0_2, %c0_3] : memref<5x96x168xf32, #tpu.memory_space<vmem>>, vector<1x96x168xf32>
    %3 = vector.shape_cast %2 : vector<1x96x168xf32> to vector<96x168xf32>
    %cst_4 = arith.constant dense<0.000000e+00> : vector<28x168xf32>
    %4 = tpu.matmul %1, %3, %cst_4 {dimension_numbers = #tpu.dot_dimension_numbers<[1], [0], [0], [1], [0, 0, 1, 1], [], []>} : vector<28x96xf32>, vector<96x168xf32>, vector<28x168xf32> -> vector<28x168xf32>
    %5 = arith.addf %0, %4 : vector<28x168xf32>
    %c1 = arith.constant 1 : index
    %c0_5 = arith.constant 0 : index
    %6 = vector.load %arg0[%c1, %c0_5] : memref<32x96xf32, #tpu.memory_space<vmem>>, vector<28x96xf32>
    %c1_6 = arith.constant 1 : index
    %c0_7 = arith.constant 0 : index
    %c0_8 = arith.constant 0 : index
    %7 = vector.load %arg1[%c1_6, %c0_7, %c0_8] : memref<5x96x168xf32, #tpu.memory_space<vmem>>, vector<1x96x168xf32>
    %8 = vector.shape_cast %7 : vector<1x96x168xf32> to vector<96x168xf32>
    %cst_9 = arith.constant dense<0.000000e+00> : vector<28x168xf32>
    %9 = tpu.matmul %6, %8, %cst_9 {dimension_numbers = #tpu.dot_dimension_numbers<[1], [0], [0], [1], [0, 0, 1, 1], [], []>} : vector<28x96xf32>, vector<96x168xf32>, vector<28x168xf32> -> vector<28x168xf32>
    %10 = arith.addf %5, %9 : vector<28x168xf32>
    %c2 = arith.constant 2 : index
    %c0_10 = arith.constant 0 : index
    %11 = vector.load %arg0[%c2, %c0_10] : memref<32x96xf32, #tpu.memory_space<vmem>>, vector<28x96xf32>
    %c2_11 = arith.constant 2 : index
    %c0_12 = arith.constant 0 : index
    %c0_13 = arith.constant 0 : index
    %12 = vector.load %arg1[%c2_11, %c0_12, %c0_13] : memref<5x96x168xf32, #tpu.memory_space<vmem>>, vector<1x96x168xf32>
    %13 = vector.shape_cast %12 : vector<1x96x168xf32> to vector<96x168xf32>
    %cst_14 = arith.constant dense<0.000000e+00> : vector<28x168xf32>
    %14 = tpu.matmul %11, %13, %cst_14 {dimension_numbers = #tpu.dot_dimension_numbers<[1], [0], [0], [1], [0, 0, 1, 1], [], []>} : vector<28x96xf32>, vector<96x168xf32>, vector<28x168xf32> -> vector<28x168xf32>
    %15 = arith.addf %10, %14 : vector<28x168xf32>
    %c3 = arith.constant 3 : index
    %c0_15 = arith.constant 0 : index
    %16 = vector.load %arg0[%c3, %c0_15] : memref<32x96xf32, #tpu.memory_space<vmem>>, vector<28x96xf32>
    %c3_16 = arith.constant 3 : index
    %c0_17 = arith.constant 0 : index
    %c0_18 = arith.constant 0 : index
    %17 = vector.load %arg1[%c3_16, %c0_17, %c0_18] : memref<5x96x168xf32, #tpu.memory_space<vmem>>, vector<1x96x168xf32>
    %18 = vector.shape_cast %17 : vector<1x96x168xf32> to vector<96x168xf32>
    %cst_19 = arith.constant dense<0.000000e+00> : vector<28x168xf32>
    %19 = tpu.matmul %16, %18, %cst_19 {dimension_numbers = #tpu.dot_dimension_numbers<[1], [0], [0], [1], [0, 0, 1, 1], [], []>} : vector<28x96xf32>, vector<96x168xf32>, vector<28x168xf32> -> vector<28x168xf32>
    %20 = arith.addf %15, %19 : vector<28x168xf32>
    %c4 = arith.constant 4 : index
    %c0_20 = arith.constant 0 : index
    %21 = vector.load %arg0[%c4, %c0_20] : memref<32x96xf32, #tpu.memory_space<vmem>>, vector<28x96xf32>
    %c4_21 = arith.constant 4 : index
    %c0_22 = arith.constant 0 : index
    %c0_23 = arith.constant 0 : index
    %22 = vector.load %arg1[%c4_21, %c0_22, %c0_23] : memref<5x96x168xf32, #tpu.memory_space<vmem>>, vector<1x96x168xf32>
    %23 = vector.shape_cast %22 : vector<1x96x168xf32> to vector<96x168xf32>
    %cst_24 = arith.constant dense<0.000000e+00> : vector<28x168xf32>
    %24 = tpu.matmul %21, %23, %cst_24 {dimension_numbers = #tpu.dot_dimension_numbers<[1], [0], [0], [1], [0, 0, 1, 1], [], []>} : vector<28x96xf32>, vector<96x168xf32>, vector<28x168xf32> -> vector<28x168xf32>
    %25 = arith.addf %20, %24 : vector<28x168xf32>
    %c0_25 = arith.constant 0 : index
    %c0_26 = arith.constant 0 : index
    %26 = vector.load %arg2[%c0_25, %c0_26] : memref<1x168xf32, #tpu.memory_space<vmem>>, vector<1x168xf32>
    %27 = vector.broadcast %26 : vector<1x168xf32> to vector<28x168xf32>
    %28 = arith.addf %25, %27 : vector<28x168xf32>
    %cst_27 = arith.constant 0.000000e+00 : f32
    %29 = vector.broadcast %cst_27 : f32 to vector<28x168xf32>
    %30 = arith.maximumf %28, %29 : vector<28x168xf32>
    %c0_28 = arith.constant 0 : index
    %c0_29 = arith.constant 0 : index
    %31 = vector.load %arg3[%c0_28, %c0_29] : memref<15x28xf32, #tpu.memory_space<vmem>>, vector<15x28xf32>
    %cst_30 = arith.constant dense<0.000000e+00> : vector<15x168xf32>
    %32 = tpu.matmul %31, %30, %cst_30 {dimension_numbers = #tpu.dot_dimension_numbers<[1], [0], [0], [1], [0, 0, 1, 1], [], []>} : vector<15x28xf32>, vector<28x168xf32>, vector<15x168xf32> -> vector<15x168xf32>
    %c0_31 = arith.constant 0 : index
    %c0_32 = arith.constant 0 : index
    %33 = vector.load %arg4[%c0_31, %c0_32] : memref<168x90xf32, #tpu.memory_space<vmem>>, vector<168x90xf32>
    %cst_33 = arith.constant dense<0.000000e+00> : vector<15x90xf32>
    %34 = tpu.matmul %32, %33, %cst_33 {dimension_numbers = #tpu.dot_dimension_numbers<[1], [0], [0], [1], [0, 0, 1, 1], [], []>} : vector<15x168xf32>, vector<168x90xf32>, vector<15x90xf32> -> vector<15x90xf32>
    %cst_34 = arith.constant 0.000000e+00 : f32
    %35 = vector.broadcast %cst_34 : f32 to vector<11x176xf32>
    %36 = vector.extract_strided_slice %34 {offsets = [0, 0], sizes = [11, 90], strides = [1, 1]} : vector<15x90xf32> to vector<11x90xf32>
    %c0_35 = arith.constant 0 : index
    %c0_36 = arith.constant 0 : index
    %c0_37 = arith.constant 0 : index
    %37 = vector.load %arg5[%c0_35, %c0_36, %c0_37] : memref<5x90x176xf32, #tpu.memory_space<vmem>>, vector<1x90x176xf32>
    %38 = vector.shape_cast %37 : vector<1x90x176xf32> to vector<90x176xf32>
    %cst_38 = arith.constant dense<0.000000e+00> : vector<11x176xf32>
    %39 = tpu.matmul %36, %38, %cst_38 {dimension_numbers = #tpu.dot_dimension_numbers<[1], [0], [0], [1], [0, 0, 1, 1], [], []>} : vector<11x90xf32>, vector<90x176xf32>, vector<11x176xf32> -> vector<11x176xf32>
    %40 = arith.addf %35, %39 : vector<11x176xf32>
    %41 = vector.extract_strided_slice %34 {offsets = [1, 0], sizes = [11, 90], strides = [1, 1]} : vector<15x90xf32> to vector<11x90xf32>
    %c1_39 = arith.constant 1 : index
    %c0_40 = arith.constant 0 : index
    %c0_41 = arith.constant 0 : index
    %42 = vector.load %arg5[%c1_39, %c0_40, %c0_41] : memref<5x90x176xf32, #tpu.memory_space<vmem>>, vector<1x90x176xf32>
    %43 = vector.shape_cast %42 : vector<1x90x176xf32> to vector<90x176xf32>
    %cst_42 = arith.constant dense<0.000000e+00> : vector<11x176xf32>
    %44 = tpu.matmul %41, %43, %cst_42 {dimension_numbers = #tpu.dot_dimension_numbers<[1], [0], [0], [1], [0, 0, 1, 1], [], []>} : vector<11x90xf32>, vector<90x176xf32>, vector<11x176xf32> -> vector<11x176xf32>
    %45 = arith.addf %40, %44 : vector<11x176xf32>
    %46 = vector.extract_strided_slice %34 {offsets = [2, 0], sizes = [11, 90], strides = [1, 1]} : vector<15x90xf32> to vector<11x90xf32>
    %c2_43 = arith.constant 2 : index
    %c0_44 = arith.constant 0 : index
    %c0_45 = arith.constant 0 : index
    %47 = vector.load %arg5[%c2_43, %c0_44, %c0_45] : memref<5x90x176xf32, #tpu.memory_space<vmem>>, vector<1x90x176xf32>
    %48 = vector.shape_cast %47 : vector<1x90x176xf32> to vector<90x176xf32>
    %cst_46 = arith.constant dense<0.000000e+00> : vector<11x176xf32>
    %49 = tpu.matmul %46, %48, %cst_46 {dimension_numbers = #tpu.dot_dimension_numbers<[1], [0], [0], [1], [0, 0, 1, 1], [], []>} : vector<11x90xf32>, vector<90x176xf32>, vector<11x176xf32> -> vector<11x176xf32>
    %50 = arith.addf %45, %49 : vector<11x176xf32>
    %51 = vector.extract_strided_slice %34 {offsets = [3, 0], sizes = [11, 90], strides = [1, 1]} : vector<15x90xf32> to vector<11x90xf32>
    %c3_47 = arith.constant 3 : index
    %c0_48 = arith.constant 0 : index
    %c0_49 = arith.constant 0 : index
    %52 = vector.load %arg5[%c3_47, %c0_48, %c0_49] : memref<5x90x176xf32, #tpu.memory_space<vmem>>, vector<1x90x176xf32>
    %53 = vector.shape_cast %52 : vector<1x90x176xf32> to vector<90x176xf32>
    %cst_50 = arith.constant dense<0.000000e+00> : vector<11x176xf32>
    %54 = tpu.matmul %51, %53, %cst_50 {dimension_numbers = #tpu.dot_dimension_numbers<[1], [0], [0], [1], [0, 0, 1, 1], [], []>} : vector<11x90xf32>, vector<90x176xf32>, vector<11x176xf32> -> vector<11x176xf32>
    %55 = arith.addf %50, %54 : vector<11x176xf32>
    %56 = vector.extract_strided_slice %34 {offsets = [4, 0], sizes = [11, 90], strides = [1, 1]} : vector<15x90xf32> to vector<11x90xf32>
    %c4_51 = arith.constant 4 : index
    %c0_52 = arith.constant 0 : index
    %c0_53 = arith.constant 0 : index
    %57 = vector.load %arg5[%c4_51, %c0_52, %c0_53] : memref<5x90x176xf32, #tpu.memory_space<vmem>>, vector<1x90x176xf32>
    %58 = vector.shape_cast %57 : vector<1x90x176xf32> to vector<90x176xf32>
    %cst_54 = arith.constant dense<0.000000e+00> : vector<11x176xf32>
    %59 = tpu.matmul %56, %58, %cst_54 {dimension_numbers = #tpu.dot_dimension_numbers<[1], [0], [0], [1], [0, 0, 1, 1], [], []>} : vector<11x90xf32>, vector<90x176xf32>, vector<11x176xf32> -> vector<11x176xf32>
    %60 = arith.addf %55, %59 : vector<11x176xf32>
    %c0_55 = arith.constant 0 : index
    %c0_56 = arith.constant 0 : index
    %61 = vector.load %arg6[%c0_55, %c0_56] : memref<1x176xf32, #tpu.memory_space<vmem>>, vector<1x176xf32>
    %62 = vector.broadcast %61 : vector<1x176xf32> to vector<11x176xf32>
    %63 = arith.addf %60, %62 : vector<11x176xf32>
    %cst_57 = arith.constant 0.000000e+00 : f32
    %64 = vector.broadcast %cst_57 : f32 to vector<11x176xf32>
    %65 = arith.maximumf %63, %64 : vector<11x176xf32>
    %c0_58 = arith.constant 0 : index
    %c0_59 = arith.constant 0 : index
    %66 = vector.load %arg7[%c0_58, %c0_59] : memref<6x11xf32, #tpu.memory_space<vmem>>, vector<6x11xf32>
    %cst_60 = arith.constant dense<0.000000e+00> : vector<6x176xf32>
    %67 = tpu.matmul %66, %65, %cst_60 {dimension_numbers = #tpu.dot_dimension_numbers<[1], [0], [0], [1], [0, 0, 1, 1], [], []>} : vector<6x11xf32>, vector<11x176xf32>, vector<6x176xf32> -> vector<6x176xf32>
    %c0_61 = arith.constant 0 : index
    %c0_62 = arith.constant 0 : index
    %68 = vector.load %arg8[%c0_61, %c0_62] : memref<176x96xf32, #tpu.memory_space<vmem>>, vector<176x96xf32>
    %cst_63 = arith.constant dense<0.000000e+00> : vector<6x96xf32>
    %69 = tpu.matmul %67, %68, %cst_63 {dimension_numbers = #tpu.dot_dimension_numbers<[1], [0], [0], [1], [0, 0, 1, 1], [], []>} : vector<6x176xf32>, vector<176x96xf32>, vector<6x96xf32> -> vector<6x96xf32>
    %c0_64 = arith.constant 0 : index
    %c0_65 = arith.constant 0 : index
    %70 = vector.load %arg10[%c0_64, %c0_65] : memref<1x120xf32, #tpu.memory_space<vmem>>, vector<1x120xf32>
    %71 = vector.extract_strided_slice %69 {offsets = [0, 0], sizes = [1, 96], strides = [1, 1]} : vector<6x96xf32> to vector<1x96xf32>
    %c0_66 = arith.constant 0 : index
    %c0_67 = arith.constant 0 : index
    %c0_68 = arith.constant 0 : index
    %72 = vector.load %arg9[%c0_66, %c0_67, %c0_68] : memref<6x96x120xf32, #tpu.memory_space<vmem>>, vector<1x96x120xf32>
    %73 = vector.shape_cast %72 : vector<1x96x120xf32> to vector<96x120xf32>
    %cst_69 = arith.constant dense<0.000000e+00> : vector<1x120xf32>
    %74 = tpu.matmul %71, %73, %cst_69 {dimension_numbers = #tpu.dot_dimension_numbers<[1], [0], [0], [1], [0, 0, 1, 1], [], []>} : vector<1x96xf32>, vector<96x120xf32>, vector<1x120xf32> -> vector<1x120xf32>
    %75 = arith.addf %70, %74 : vector<1x120xf32>
    %76 = vector.extract_strided_slice %69 {offsets = [1, 0], sizes = [1, 96], strides = [1, 1]} : vector<6x96xf32> to vector<1x96xf32>
    %c1_70 = arith.constant 1 : index
    %c0_71 = arith.constant 0 : index
    %c0_72 = arith.constant 0 : index
    %77 = vector.load %arg9[%c1_70, %c0_71, %c0_72] : memref<6x96x120xf32, #tpu.memory_space<vmem>>, vector<1x96x120xf32>
    %78 = vector.shape_cast %77 : vector<1x96x120xf32> to vector<96x120xf32>
    %cst_73 = arith.constant dense<0.000000e+00> : vector<1x120xf32>
    %79 = tpu.matmul %76, %78, %cst_73 {dimension_numbers = #tpu.dot_dimension_numbers<[1], [0], [0], [1], [0, 0, 1, 1], [], []>} : vector<1x96xf32>, vector<96x120xf32>, vector<1x120xf32> -> vector<1x120xf32>
    %80 = arith.addf %75, %79 : vector<1x120xf32>
    %81 = vector.extract_strided_slice %69 {offsets = [2, 0], sizes = [1, 96], strides = [1, 1]} : vector<6x96xf32> to vector<1x96xf32>
    %c2_74 = arith.constant 2 : index
    %c0_75 = arith.constant 0 : index
    %c0_76 = arith.constant 0 : index
    %82 = vector.load %arg9[%c2_74, %c0_75, %c0_76] : memref<6x96x120xf32, #tpu.memory_space<vmem>>, vector<1x96x120xf32>
    %83 = vector.shape_cast %82 : vector<1x96x120xf32> to vector<96x120xf32>
    %cst_77 = arith.constant dense<0.000000e+00> : vector<1x120xf32>
    %84 = tpu.matmul %81, %83, %cst_77 {dimension_numbers = #tpu.dot_dimension_numbers<[1], [0], [0], [1], [0, 0, 1, 1], [], []>} : vector<1x96xf32>, vector<96x120xf32>, vector<1x120xf32> -> vector<1x120xf32>
    %85 = arith.addf %80, %84 : vector<1x120xf32>
    %86 = vector.extract_strided_slice %69 {offsets = [3, 0], sizes = [1, 96], strides = [1, 1]} : vector<6x96xf32> to vector<1x96xf32>
    %c3_78 = arith.constant 3 : index
    %c0_79 = arith.constant 0 : index
    %c0_80 = arith.constant 0 : index
    %87 = vector.load %arg9[%c3_78, %c0_79, %c0_80] : memref<6x96x120xf32, #tpu.memory_space<vmem>>, vector<1x96x120xf32>
    %88 = vector.shape_cast %87 : vector<1x96x120xf32> to vector<96x120xf32>
    %cst_81 = arith.constant dense<0.000000e+00> : vector<1x120xf32>
    %89 = tpu.matmul %86, %88, %cst_81 {dimension_numbers = #tpu.dot_dimension_numbers<[1], [0], [0], [1], [0, 0, 1, 1], [], []>} : vector<1x96xf32>, vector<96x120xf32>, vector<1x120xf32> -> vector<1x120xf32>
    %90 = arith.addf %85, %89 : vector<1x120xf32>
    %91 = vector.extract_strided_slice %69 {offsets = [4, 0], sizes = [1, 96], strides = [1, 1]} : vector<6x96xf32> to vector<1x96xf32>
    %c4_82 = arith.constant 4 : index
    %c0_83 = arith.constant 0 : index
    %c0_84 = arith.constant 0 : index
    %92 = vector.load %arg9[%c4_82, %c0_83, %c0_84] : memref<6x96x120xf32, #tpu.memory_space<vmem>>, vector<1x96x120xf32>
    %93 = vector.shape_cast %92 : vector<1x96x120xf32> to vector<96x120xf32>
    %cst_85 = arith.constant dense<0.000000e+00> : vector<1x120xf32>
    %94 = tpu.matmul %91, %93, %cst_85 {dimension_numbers = #tpu.dot_dimension_numbers<[1], [0], [0], [1], [0, 0, 1, 1], [], []>} : vector<1x96xf32>, vector<96x120xf32>, vector<1x120xf32> -> vector<1x120xf32>
    %95 = arith.addf %90, %94 : vector<1x120xf32>
    %96 = vector.extract_strided_slice %69 {offsets = [5, 0], sizes = [1, 96], strides = [1, 1]} : vector<6x96xf32> to vector<1x96xf32>
    %c5 = arith.constant 5 : index
    %c0_86 = arith.constant 0 : index
    %c0_87 = arith.constant 0 : index
    %97 = vector.load %arg9[%c5, %c0_86, %c0_87] : memref<6x96x120xf32, #tpu.memory_space<vmem>>, vector<1x96x120xf32>
    %98 = vector.shape_cast %97 : vector<1x96x120xf32> to vector<96x120xf32>
    %cst_88 = arith.constant dense<0.000000e+00> : vector<1x120xf32>
    %99 = tpu.matmul %96, %98, %cst_88 {dimension_numbers = #tpu.dot_dimension_numbers<[1], [0], [0], [1], [0, 0, 1, 1], [], []>} : vector<1x96xf32>, vector<96x120xf32>, vector<1x120xf32> -> vector<1x120xf32>
    %100 = arith.addf %95, %99 : vector<1x120xf32>
    %cst_89 = arith.constant 0.000000e+00 : f32
    %101 = vector.broadcast %cst_89 : f32 to vector<1x120xf32>
    %102 = arith.maximumf %100, %101 : vector<1x120xf32>
    %c0_90 = arith.constant 0 : index
    %c0_91 = arith.constant 0 : index
    %103 = vector.load %arg11[%c0_90, %c0_91] : memref<120x84xf32, #tpu.memory_space<vmem>>, vector<120x84xf32>
    %cst_92 = arith.constant dense<0.000000e+00> : vector<1x84xf32>
    %104 = tpu.matmul %102, %103, %cst_92 {dimension_numbers = #tpu.dot_dimension_numbers<[1], [0], [0], [1], [0, 0, 1, 1], [], []>} : vector<1x120xf32>, vector<120x84xf32>, vector<1x84xf32> -> vector<1x84xf32>
    %c0_93 = arith.constant 0 : index
    %c0_94 = arith.constant 0 : index
    %105 = vector.load %arg12[%c0_93, %c0_94] : memref<1x84xf32, #tpu.memory_space<vmem>>, vector<1x84xf32>
    %106 = arith.addf %104, %105 : vector<1x84xf32>
    %cst_95 = arith.constant 0.000000e+00 : f32
    %107 = vector.broadcast %cst_95 : f32 to vector<1x84xf32>
    %108 = arith.maximumf %106, %107 : vector<1x84xf32>
    %c0_96 = arith.constant 0 : index
    %c0_97 = arith.constant 0 : index
    %109 = vector.load %arg13[%c0_96, %c0_97] : memref<84x10xf32, #tpu.memory_space<vmem>>, vector<84x10xf32>
    %cst_98 = arith.constant dense<0.000000e+00> : vector<1x10xf32>
    %110 = tpu.matmul %108, %109, %cst_98 {dimension_numbers = #tpu.dot_dimension_numbers<[1], [0], [0], [1], [0, 0, 1, 1], [], []>} : vector<1x84xf32>, vector<84x10xf32>, vector<1x10xf32> -> vector<1x10xf32>
    %c0_99 = arith.constant 0 : index
    %c0_100 = arith.constant 0 : index
    %111 = vector.load %arg14[%c0_99, %c0_100] : memref<1x10xf32, #tpu.memory_space<vmem>>, vector<1x10xf32>
    %112 = arith.addf %110, %111 : vector<1x10xf32>
    %113 = tpu.iota {dimensions = array<i32: 1>} : vector<1x10xi32>
    %c9_i32 = arith.constant 9 : i32
    %114 = vector.broadcast %c9_i32 : i32 to vector<1x10xi32>
    %115 = arith.cmpi slt, %113, %114 : vector<1x10xi32>
    %c1_i32 = arith.constant 1 : i32
    %116 = vector.broadcast %c1_i32 : i32 to vector<1x10xi32>
    %117 = arith.andi %113, %116 : vector<1x10xi32>
    %c0_i32 = arith.constant 0 : i32
    %118 = vector.broadcast %c0_i32 : i32 to vector<1x10xi32>
    %119 = arith.cmpi eq, %117, %118 : vector<1x10xi32>
    %120 = arith.andi %115, %119 : vector<1x10xi1>
    %cst_101 = arith.constant 0.000000e+00 : f32
    %121 = vector.broadcast %cst_101 : f32 to vector<1x10xf32>
    %122 = arith.select %120, %112, %121 : vector<1x10xi1>, vector<1x10xf32>
    %cst_102 = arith.constant dense<0.000000e+00> : vector<1xf32>
    %123 = vector.multi_reduction <add>, %122, %cst_102 [1] : vector<1x10xf32> to vector<1xf32>
    %124 = vector.shape_cast %123 : vector<1xf32> to vector<1x1xf32>
    %cst_103 = arith.constant 2.000000e-01 : f32
    %125 = vector.broadcast %cst_103 : f32 to vector<1x1xf32>
    %126 = arith.mulf %124, %125 : vector<1x1xf32>
    %c0_104 = arith.constant 0 : index
    %c0_105 = arith.constant 0 : index
    %127 = vector.load %arg15[%c0_104, %c0_105] : memref<1x1xf32, #tpu.memory_space<vmem>>, vector<1x1xf32>
    tpu.vector_store %arg15[%c0_104, %c0_105], %126 {strides = array<i32>} : memref<1x1xf32, #tpu.memory_space<vmem>>, vector<1x1xf32>,
    return
  }
}

</mosaic_0001>

<bundles_post_ra>
// kernel: cnn_invalid_forward.1
= control target key start
LH: loop header
LB: loop body
LE: loop exit
PB: predicated region body
PF: predicated region fallthrough
CT: control target
= control target key end

     0   :  { %vm108_vm0 = vcmask 785408   ;;  %s3418_s0 = inlined_call_operand.vmem [shape: f32[32,96], index: 0, kind: input, shape index: {}]   ;;  %s3419_s1 = inlined_call_operand.vmem [shape: f32[5,96,168], index: 1, kind: input, shape index: {}]   ;;  %s3420_s2 = inlined_call_operand.vmem [shape: f32[1,168], index: 2, kind: input, shape index: {}]   ;;  %s3421_s3 = inlined_call_operand.vmem [shape: f32[15,28], index: 3, kind: input, shape index: {}]   ;;  %s3422_s4 = inlined_call_operand.vmem [shape: f32[168,90], index: 4, kind: input, shape index: {}]   ;;  %s3423_s5 = inlined_call_operand.vmem [shape: f32[5,90,176], index: 5, kind: input, shape index: {}]   ;;  %s3424_s6 = inlined_call_operand.vmem [shape: f32[1,176], index: 6, kind: input, shape index: {}]   ;;  %s3425_s7 = inlined_call_operand.vmem [shape: f32[6,11], index: 7, kind: input, shape index: {}]   ;;  %s3426_s8 = inlined_call_operand.vmem [shape: f32[176,96], index: 8, kind: input, shape index: {}]   ;;  %s3427_s9 = inlined_call_operand.vmem [shape: f32[6,96,120], index: 9, kind: input, shape index: {}]   ;;  %s3428_s10 = inlined_call_operand.vmem [shape: f32[1,120], index: 10, kind: input, shape index: {}]   ;;  %s3429_s11 = inlined_call_operand.vmem [shape: f32[120,84], index: 11, kind: input, shape index: {}]   ;;  %s3430_s12 = inlined_call_operand.vmem [shape: f32[1,84], index: 12, kind: input, shape index: {}]   ;;  %s3431_s13 = inlined_call_operand.vmem [shape: f32[84,10], index: 13, kind: input, shape index: {}]   ;;  %s3432_s14 = inlined_call_operand.vmem [shape: f32[1,10], index: 14, kind: input, shape index: {}]   ;;  %s3433_s15 = inlined_call_operand.hbm [shape: f32[1,1], index: 15, kind: output, shape index: {}]  }
   0x1   :  { %v1650_v0 = vld [vmem:[%s3419_s1 + $0x170] sm:$0xff]  ;;  %v1651_v1 = vld [vmem:[%s3419_s1 + $0x178] sm:$0xff]  ;;  %v1648_v4 = vld [vmem:[%s3419_s1 + $0x160] sm:$0xff] }
   0x2   :  { %v77_v2 = vld [vmem:[%s3419_s1 + $0xb0] sm:$0xff]  ;;  %125 = vmatpush.msra.mxu0 %v1650_v0  ;;  %154 = vmatpush.msra.mxu1 %v1651_v1  ;;  %v78_v3 = vld [vmem:[%s3419_s1 + $0xb8] sm:$0xff]  ;;  %v1649_v5 = vld [vmem:[%s3419_s1 + $0x168] sm:$0xff] }
   0x3   :  { %195 = vmatpush.msra.mxu2 %v77_v2  ;;  %224 = vmatpush.msra.mxu3 %v78_v3  ;;  %v75_v6 = vld [vmem:[%s3419_s1 + $0xa0] sm:$0xff]  ;;  %v76_v7 = vld [vmem:[%s3419_s1 + $0xa8] sm:$0xff]  ;;  %v1646_v8 = vld [vmem:[%s3419_s1 + $0x150] sm:$0xff] }
   0x4   :  { %126 = vmatpush.msra.mxu0 %v1648_v4  ;;  %155 = vmatpush.msra.mxu1 %v1649_v5  ;;  %v1647_v9 = vld [vmem:[%s3419_s1 + $0x158] sm:$0xff]  ;;  %v73_v10 = vld [vmem:[%s3419_s1 + $0x90] sm:$0xff]  ;;  %v1644_v12 = vld [vmem:[%s3419_s1 + $0x140] sm:$0xff] }
   0x5   :  { %v74_v11 = vld [vmem:[%s3419_s1 + $0x98] sm:$0xff]  ;;  %196 = vmatpush.msra.mxu2 %v75_v6  ;;  %225 = vmatpush.msra.mxu3 %v76_v7  ;;  %v1645_v13 = vld [vmem:[%s3419_s1 + $0x148] sm:$0xff]  ;;  %v71_v14 = vld [vmem:[%s3419_s1 + $0x80] sm:$0xff] }
   0x6   :  { %127 = vmatpush.msra.mxu0 %v1646_v8  ;;  %156 = vmatpush.msra.mxu1 %v1647_v9  ;;  %v72_v15 = vld [vmem:[%s3419_s1 + $0x88] sm:$0xff]  ;;  %v1642_v16 = vld [vmem:[%s3419_s1 + $0x130] sm:$0xff]  ;;  %v1643_v17 = vld [vmem:[%s3419_s1 + $0x138] sm:$0xff] }
   0x7   :  { %197 = vmatpush.msra.mxu2 %v73_v10  ;;  %226 = vmatpush.msra.mxu3 %v74_v11  ;;  %v69_v18 = vld [vmem:[%s3419_s1 + $0x70] sm:$0xff]  ;;  %v70_v19 = vld [vmem:[%s3419_s1 + $0x78] sm:$0xff]  ;;  %v1640_v20 = vld [vmem:[%s3419_s1 + $0x120] sm:$0xff] }
   0x8   :  { %128 = vmatpush.msra.mxu0 %v1644_v12  ;;  %157 = vmatpush.msra.mxu1 %v1645_v13  ;;  %v1641_v21 = vld [vmem:[%s3419_s1 + $0x128] sm:$0xff]  ;;  %v67_v22 = vld [vmem:[%s3419_s1 + $0x60] sm:$0xff]  ;;  %v1638_v24 = vld [vmem:[%s3419_s1 + $0x110] sm:$0xff] }
   0x9   :  { %198 = vmatpush.msra.mxu2 %v71_v14  ;;  %227 = vmatpush.msra.mxu3 %v72_v15  ;;  %v68_v23 = vld [vmem:[%s3419_s1 + $0x68] sm:$0xff]  ;;  %v1639_v25 = vld [vmem:[%s3419_s1 + $0x118] sm:$0xff]  ;;  %v65_v26 = vld [vmem:[%s3419_s1 + $0x50] sm:$0xff] }
   0xa   :  { %129 = vmatpush.msra.mxu0 %v1642_v16  ;;  %158 = vmatpush.msra.mxu1 %v1643_v17  ;;  %v66_v27 = vld [vmem:[%s3419_s1 + $0x58] sm:$0xff]  ;;  %v1636_v28 = vld [vmem:[%s3419_s1 + $0x100] sm:$0xff]  ;;  %v1637_v29 = vld [vmem:[%s3419_s1 + $0x108] sm:$0xff] }
   0xb   :  { %199 = vmatpush.msra.mxu2 %v69_v18  ;;  %228 = vmatpush.msra.mxu3 %v70_v19  ;;  %v63_v30 = vld [vmem:[%s3419_s1 + $0x40] sm:$0xff]  ;;  %v64_v31 = vld [vmem:[%s3419_s1 + $0x48] sm:$0xff]  ;;  %v1634_v32 = vld [vmem:[%s3419_s1 + $0xf0] sm:$0xff] }
   0xc   :  { %130 = vmatpush.msra.mxu0 %v1640_v20  ;;  %159 = vmatpush.msra.mxu1 %v1641_v21  ;;  %v1635_v33 = vld [vmem:[%s3419_s1 + $0xf8] sm:$0xff]  ;;  %v61_v34 = vld [vmem:[%s3419_s1 + $0x30] sm:$0xff]  ;;  %v1632_v36 = vld [vmem:[%s3419_s1 + $0xe0] sm:$0xff] }
   0xd   :  { %200 = vmatpush.msra.mxu2 %v67_v22  ;;  %229 = vmatpush.msra.mxu3 %v68_v23  ;;  %v62_v35 = vld [vmem:[%s3419_s1 + $0x38] sm:$0xff]  ;;  %v1633_v37 = vld [vmem:[%s3419_s1 + $0xe8] sm:$0xff]  ;;  %v59_v38 = vld [vmem:[%s3419_s1 + $0x20] sm:$0xff] }
   0xe   :  { %131 = vmatpush.msra.mxu0 %v1638_v24  ;;  %160 = vmatpush.msra.mxu1 %v1639_v25  ;;  %v60_v39 = vld [vmem:[%s3419_s1 + $0x28] sm:$0xff]  ;;  %v1630_v40 = vld [vmem:[%s3419_s1 + $0xd0] sm:$0xff]  ;;  %v1631_v41 = vld [vmem:[%s3419_s1 + $0xd8] sm:$0xff] }
   0xf   :  { %201 = vmatpush.msra.mxu2 %v65_v26  ;;  %230 = vmatpush.msra.mxu3 %v66_v27  ;;  %v57_v42 = vld [vmem:[%s3419_s1 + $0x10] sm:$0xff]  ;;  %v58_v43 = vld [vmem:[%s3419_s1 + $0x18] sm:$0xff]  ;;  %v1628_v44 = vld [vmem:[%s3419_s1 + $0xc0] sm:$0xff] }
  0x10   :  { %132 = vmatpush.msra.mxu0 %v1636_v28  ;;  %161 = vmatpush.msra.mxu1 %v1637_v29  ;;  %v1629_v45 = vld [vmem:[%s3419_s1 + $0xc8] sm:$0xff]  ;;  %v55_v46 = vld [vmem:[%s3419_s1] sm:$0xff]  ;;  %v1690_v50 = vld [vmem:[%s3419_s1 + $0x230] sm:$0xff] }
  0x11   :  { %202 = vmatpush.msra.mxu2 %v63_v30  ;;  %231 = vmatpush.msra.mxu3 %v64_v31  ;;  %v56_v47 = vld [vmem:[%s3419_s1 + $0x8] sm:$0xff]  ;;  %v51_v49 = vld [vmem:[%s3418_s0] sm:$0xff]  ;;  %v1691_v51 = vld [vmem:[%s3419_s1 + $0x238] sm:$0xff] }
  0x12   :  { %133 = vmatpush.msra.mxu0 %v1634_v32  ;;  %162 = vmatpush.msra.mxu1 %v1635_v33  ;;  %v79_v48 = vld [vmem:[%s3418_s0 + $0x1] sm:$0xff]  ;;  %v1722_v52 = vld [vmem:[%s3419_s1 + $0x2f0] sm:$0xff]  ;;  %v1723_v53 = vld [vmem:[%s3419_s1 + $0x2f8] sm:$0xff] }
  0x13   :  { %203 = vmatpush.msra.mxu2 %v61_v34  ;;  %232 = vmatpush.msra.mxu3 %v62_v35  ;;  %v1688_v54 = vld [vmem:[%s3419_s1 + $0x220] sm:$0xff]  ;;  %v1689_v55 = vld [vmem:[%s3419_s1 + $0x228] sm:$0xff]  ;;  %v1686_v58 = vld [vmem:[%s3419_s1 + $0x210] sm:$0xff] }
  0x14   :  { %134 = vmatpush.msra.mxu0 %v1632_v36  ;;  %163 = vmatpush.msra.mxu1 %v1633_v37  ;;  %v1720_v56 = vld [vmem:[%s3419_s1 + $0x2e0] sm:$0xff]  ;;  %v1721_v57 = vld [vmem:[%s3419_s1 + $0x2e8] sm:$0xff]  ;;  %v1687_v59 = vld [vmem:[%s3419_s1 + $0x218] sm:$0xff] }
  0x15   :  { %204 = vmatpush.msra.mxu2 %v59_v38  ;;  %233 = vmatpush.msra.mxu3 %v60_v39  ;;  %v1718_v60 = vld [vmem:[%s3419_s1 + $0x2d0] sm:$0xff]  ;;  %v1719_v61 = vld [vmem:[%s3419_s1 + $0x2d8] sm:$0xff]  ;;  %v52_v63 = vld [vmem:[%s3418_s0 + $0x8] sm:$0xff] }
  0x16   :  { %135 = vmatpush.msra.mxu0 %v1630_v40  ;;  %164 = vmatpush.msra.mxu1 %v1631_v41  ;;  %v80_v62 = vld [vmem:[%s3418_s0 + $0x9] sm:$0xff]  ;;  %v1684_v0 = vld [vmem:[%s3419_s1 + $0x200] sm:$0xff]  ;;  %v1683_v5 = vld [vmem:[%s3419_s1 + $0x1f8] sm:$0xff] }
  0x17   :  { %205 = vmatpush.msra.mxu2 %v57_v42  ;;  %234 = vmatpush.msra.mxu3 %v58_v43  ;;  %v1685_v1 = vld [vmem:[%s3419_s1 + $0x208] sm:$0xff]  ;;  %v1716_v2 = vld [vmem:[%s3419_s1 + $0x2c0] sm:$0xff]  ;;  %v1682_v4 = vld [vmem:[%s3419_s1 + $0x1f0] sm:$0xff] }
  0x18   :  { %136 = vmatpush.msra.mxu0 %v1628_v44  ;;  %165 = vmatpush.msra.mxu1 %v1629_v45  ;;  %v1717_v3 = vld [vmem:[%s3419_s1 + $0x2c8] sm:$0xff]  ;;  %v1714_v6 = vld [vmem:[%s3419_s1 + $0x2b0] sm:$0xff]  ;;  %v1715_v7 = vld [vmem:[%s3419_s1 + $0x2b8] sm:$0xff] }
  0x19   :  { %206 = vmatpush.msra.mxu2 %v55_v46  ;;  %235 = vmatpush.msra.mxu3 %v56_v47  ;;  %v1680_v8 = vld [vmem:[%s3419_s1 + $0x1e0] sm:$0xff]  ;;  %v1681_v9 = vld [vmem:[%s3419_s1 + $0x1e8] sm:$0xff]  ;;  %v81_v12 = vld [vmem:[%s3418_s0 + $0x11] sm:$0xff] }
  0x1a   :  { %1652 = vmatmul.msk.f32.vlgmr.msra.gmra.mxu0 %vm108_vm0, %v79_v48  ;;  %1656 = vmatmul.msk.f32.vlgmr.msra.gmra.mxu1 %vm108_vm0, %v79_v48  ;;  %v1712_v10 = vld [vmem:[%s3419_s1 + $0x2a0] sm:$0xff]  ;;  %v1713_v11 = vld [vmem:[%s3419_s1 + $0x2a8] sm:$0xff]  ;;  %v53_v13 = vld [vmem:[%s3418_s0 + $0x10] sm:$0xff] }
  0x1b   :  { %1660 = vmatmul.msk.f32.vlgmr.msra.gmra.mxu2 %vm108_vm0, %v51_v49  ;;  %1664 = vmatmul.msk.f32.vlgmr.msra.gmra.mxu3 %vm108_vm0, %v51_v49 }
  0x1c   :  { %294 = vmatpush.msrb.mxu0 %v1690_v50  ;;  %323 = vmatpush.msrb.mxu1 %v1691_v51 }
  0x1d   :  { %401 = vmatpush.msrb.mxu2 %v1722_v52  ;;  %430 = vmatpush.msrb.mxu3 %v1723_v53 }
  0x1e   :  { %295 = vmatpush.msrb.mxu0 %v1688_v54  ;;  %324 = vmatpush.msrb.mxu1 %v1689_v55 }
  0x1f   :  { %402 = vmatpush.msrb.mxu2 %v1720_v56  ;;  %431 = vmatpush.msrb.mxu3 %v1721_v57 }
  0x20   :  { %296 = vmatpush.msrb.mxu0 %v1686_v58  ;;  %325 = vmatpush.msrb.mxu1 %v1687_v59 }
  0x21   :  { %403 = vmatpush.msrb.mxu2 %v1718_v60  ;;  %432 = vmatpush.msrb.mxu3 %v1719_v61 }
  0x22   :  { %1653 = vmatmul.msk.f32.gmra.mxu0 %vm108_vm0, %v80_v62  ;;  %1657 = vmatmul.msk.f32.gmra.mxu1 %vm108_vm0, %v80_v62 }
  0x23   :  { %1661 = vmatmul.msk.f32.gmra.mxu2 %vm108_vm0, %v52_v63  ;;  %1665 = vmatmul.msk.f32.gmra.mxu3 %vm108_vm0, %v52_v63 }
  0x24   :  { %297 = vmatpush.msrb.mxu0 %v1684_v0  ;;  %326 = vmatpush.msrb.mxu1 %v1685_v1 }
  0x25   :  { %404 = vmatpush.msrb.mxu2 %v1716_v2  ;;  %433 = vmatpush.msrb.mxu3 %v1717_v3 }
  0x26   :  { %298 = vmatpush.msrb.mxu0 %v1682_v4  ;;  %327 = vmatpush.msrb.mxu1 %v1683_v5 }
  0x27   :  { %405 = vmatpush.msrb.mxu2 %v1714_v6  ;;  %434 = vmatpush.msrb.mxu3 %v1715_v7 }
  0x28   :  { %299 = vmatpush.msrb.mxu0 %v1680_v8  ;;  %328 = vmatpush.msrb.mxu1 %v1681_v9 }
  0x29   :  { %20 = vsyncpa [#allocation3], 0  ;;  %406 = vmatpush.msrb.mxu2 %v1712_v10  ;;  %435 = vmatpush.msrb.mxu3 %v1713_v11  ;;  %v1678_v14 = vld [vmem:[%s3419_s1 + $0x1d0] sm:$0xff]  ;;  %v1679_v15 = vld [vmem:[%s3419_s1 + $0x1d8] sm:$0xff]  ;;  %vm601_vm1 = vcmask 1043456   ;;  %vm594_vm2 = vcmask 228352  }
  0x2a   :  { %1654 = vmatmul.msk.f32.gmra.mxu0 %vm108_vm0, %v81_v12  ;;  %1658 = vmatmul.msk.f32.gmra.mxu1 %vm108_vm0, %v81_v12  ;;  %v1710_v16 = vld [vmem:[%s3419_s1 + $0x290] sm:$0xff]  ;;  %v1711_v17 = vld [vmem:[%s3419_s1 + $0x298] sm:$0xff]  ;;  %v1676_v18 = vld [vmem:[%s3419_s1 + $0x1c0] sm:$0xff]  ;;  %vm788_vm3 = vcmask 1041408   ;;  %vm675_vm4 = vcmask 326656   ;;  %vm783_vm5 = vcmask 736256  }
  0x2b   :  { %1662 = vmatmul.msk.f32.gmra.mxu2 %vm108_vm0, %v53_v13  ;;  %1666 = vmatmul.msk.f32.gmra.mxu3 %vm108_vm0, %v53_v13  ;;  %v1677_v19 = vld [vmem:[%s3419_s1 + $0x1c8] sm:$0xff]  ;;  %v1708_v20 = vld [vmem:[%s3419_s1 + $0x280] sm:$0xff]  ;;  %v1674_v22 = vld [vmem:[%s3419_s1 + $0x1b0] sm:$0xff]  ;;  %vm779_vm6 = vcmask 1046528   ;;  %vm922_vm7 = vcmask 1045504   ;;  %vm1011_vm8 = vcmask 1044480  }
  0x2c   :  { %300 = vmatpush.msrb.mxu0 %v1678_v14  ;;  %329 = vmatpush.msrb.mxu1 %v1679_v15  ;;  %v1709_v21 = vld [vmem:[%s3419_s1 + $0x288] sm:$0xff]  ;;  %v1675_v23 = vld [vmem:[%s3419_s1 + $0x1b8] sm:$0xff]  ;;  %v1706_v24 = vld [vmem:[%s3419_s1 + $0x270] sm:$0xff]  ;;  %vm1182_vm9 = vcmask 1042432   ;;  %vm1178_vm10 = vcmask 89088   ;;  %vm1251_vm11 = vcmask 392192  }
  0x2d   :  { %407 = vmatpush.msrb.mxu2 %v1710_v16  ;;  %436 = vmatpush.msrb.mxu3 %v1711_v17  ;;  %v1707_v25 = vld [vmem:[%s3419_s1 + $0x278] sm:$0xff]  ;;  %v1672_v28 = vld [vmem:[%s3419_s1 + $0x1a0] sm:$0xff]  ;;  %v1673_v29 = vld [vmem:[%s3419_s1 + $0x1a8] sm:$0xff]  ;;  %vm1534_vm12 = vcmask 982016   ;;  %vm1571_vm13 = vcmask 687104  }
  0x2e   :  { %301 = vmatpush.msrb.mxu0 %v1676_v18  ;;  %330 = vmatpush.msrb.mxu1 %v1677_v19  ;;  %v82_v26 = vld [vmem:[%s3418_s0 + $0x19] sm:$0xf]  ;;  %v1704_v30 = vld [vmem:[%s3419_s1 + $0x260] sm:$0xff]  ;;  %v1705_v31 = vld [vmem:[%s3419_s1 + $0x268] sm:$0xff] }
  0x2f   :  { %408 = vmatpush.msrb.mxu2 %v1708_v20  ;;  %437 = vmatpush.msrb.mxu3 %v1709_v21  ;;  %v54_v27 = vld [vmem:[%s3418_s0 + $0x18] sm:$0xf]  ;;  %v1670_v32 = vld [vmem:[%s3419_s1 + $0x190] sm:$0xff]  ;;  %v1668_v36 = vld [vmem:[%s3419_s1 + $0x180] sm:$0xff] }
  0x30   :  { %302 = vmatpush.msrb.mxu0 %v1674_v22  ;;  %331 = vmatpush.msrb.mxu1 %v1675_v23  ;;  %v1671_v33 = vld [vmem:[%s3419_s1 + $0x198] sm:$0xff]  ;;  %v1702_v34 = vld [vmem:[%s3419_s1 + $0x250] sm:$0xff]  ;;  %v1669_v37 = vld [vmem:[%s3419_s1 + $0x188] sm:$0xff] }
  0x31   :  { %409 = vmatpush.msrb.mxu2 %v1706_v24  ;;  %438 = vmatpush.msrb.mxu3 %v1707_v25  ;;  %v1703_v35 = vld [vmem:[%s3419_s1 + $0x258] sm:$0xff]  ;;  %v1700_v38 = vld [vmem:[%s3419_s1 + $0x240] sm:$0xff]  ;;  %v1701_v39 = vld [vmem:[%s3419_s1 + $0x248] sm:$0xff] }
  0x32   :  { %1655 = vmatmul.msk.f32.gmra.mxu0 %vm108_vm0, %v82_v26  ;;  %1659 = vmatmul.msk.f32.gmra.mxu1 %vm108_vm0, %v82_v26  ;;  %v249_v40 = vld [vmem:[%s3418_s0 + $0x2] sm:$0xff]  ;;  %v1754_v42 = vld [vmem:[%s3419_s1 + $0x3b0] sm:$0xff]  ;;  %v1755_v43 = vld [vmem:[%s3419_s1 + $0x3b8] sm:$0xff] }
  0x33   :  { %1663 = vmatmul.msk.f32.gmra.mxu2 %vm108_vm0, %v54_v27  ;;  %1667 = vmatmul.msk.f32.gmra.mxu3 %vm108_vm0, %v54_v27  ;;  %v356_v41 = vld [vmem:[%s3418_s0 + $0x3] sm:$0xff]  ;;  %v1750_v46 = vld [vmem:[%s3419_s1 + $0x390] sm:$0xff]  ;;  %v1751_v47 = vld [vmem:[%s3419_s1 + $0x398] sm:$0xff] }
  0x34   :  { %303 = vmatpush.msrb.mxu0 %v1672_v28  ;;  %332 = vmatpush.msrb.mxu1 %v1673_v29  ;;  %v1752_v44 = vld [vmem:[%s3419_s1 + $0x3a0] sm:$0xff]  ;;  %v1753_v45 = vld [vmem:[%s3419_s1 + $0x3a8] sm:$0xff]  ;;  %v1746_v52 = vld [vmem:[%s3419_s1 + $0x370] sm:$0xff] }
  0x35   :  { %410 = vmatpush.msrb.mxu2 %v1704_v30  ;;  %439 = vmatpush.msrb.mxu3 %v1705_v31  ;;  %v250_v48 = vld [vmem:[%s3418_s0 + $0xa] sm:$0xff]  ;;  %v1748_v50 = vld [vmem:[%s3419_s1 + $0x380] sm:$0xff]  ;;  %v1747_v53 = vld [vmem:[%s3419_s1 + $0x378] sm:$0xff] }
  0x36   :  { %304 = vmatpush.msrb.mxu0 %v1670_v32  ;;  %333 = vmatpush.msrb.mxu1 %v1671_v33  ;;  %v357_v49 = vld [vmem:[%s3418_s0 + $0xb] sm:$0xff]  ;;  %v1744_v54 = vld [vmem:[%s3419_s1 + $0x360] sm:$0xff]  ;;  %v358_v57 = vld [vmem:[%s3418_s0 + $0x13] sm:$0xff] }
  0x37   :  { %411 = vmatpush.msrb.mxu2 %v1702_v34  ;;  %440 = vmatpush.msrb.mxu3 %v1703_v35  ;;  %v1749_v51 = vld [vmem:[%s3419_s1 + $0x388] sm:$0xff]  ;;  %v251_v56 = vld [vmem:[%s3418_s0 + $0x12] sm:$0xff]  ;;  %v1740_v60 = vld [vmem:[%s3419_s1 + $0x340] sm:$0xff] }
  0x38   :  { %305 = vmatpush.msrb.mxu0 %v1668_v36  ;;  %334 = vmatpush.msrb.mxu1 %v1669_v37  ;;  %v1745_v55 = vld [vmem:[%s3419_s1 + $0x368] sm:$0xff]  ;;  %v1742_v58 = vld [vmem:[%s3419_s1 + $0x350] sm:$0xff]  ;;  %v1743_v59 = vld [vmem:[%s3419_s1 + $0x358] sm:$0xff] }
  0x39   :  { %412 = vmatpush.msrb.mxu2 %v1700_v38  ;;  %441 = vmatpush.msrb.mxu3 %v1701_v39  ;;  %v1741_v61 = vld [vmem:[%s3419_s1 + $0x348] sm:$0xff]  ;;  %v1738_v62 = vld [vmem:[%s3419_s1 + $0x330] sm:$0xff]  ;;  %v1739_v63 = vld [vmem:[%s3419_s1 + $0x338] sm:$0xff] }
  0x3a   :  { %1692 = vmatmul.msk.f32.vlgmr.msrb.gmra.mxu0 %vm108_vm0, %v249_v40  ;;  %1696 = vmatmul.msk.f32.vlgmr.msrb.gmra.mxu1 %vm108_vm0, %v249_v40  ;;  %v252_v0 = vld [vmem:[%s3418_s0 + $0x1a] sm:$0xf]  ;;  %v1736_v2 = vld [vmem:[%s3419_s1 + $0x320] sm:$0xff]  ;;  %v1737_v3 = vld [vmem:[%s3419_s1 + $0x328] sm:$0xff] }
  0x3b   :  { %1724 = vmatmul.msk.f32.vlgmr.msrb.gmra.mxu2 %vm108_vm0, %v356_v41  ;;  %1728 = vmatmul.msk.f32.vlgmr.msrb.gmra.mxu3 %vm108_vm0, %v356_v41  ;;  %v359_v1 = vld [vmem:[%s3418_s0 + $0x1b] sm:$0xf]  ;;  %v1734_v4 = vld [vmem:[%s3419_s1 + $0x310] sm:$0xff]  ;;  %v1732_v6 = vld [vmem:[%s3419_s1 + $0x300] sm:$0xff] }
  0x3c   :  { %508 = vmatpush.msra.mxu0 %v1754_v42  ;;  %537 = vmatpush.msra.mxu1 %v1755_v43  ;;  %v1735_v5 = vld [vmem:[%s3419_s1 + $0x318] sm:$0xff]  ;;  %v1733_v7 = vld [vmem:[%s3419_s1 + $0x308] sm:$0xff] }
  0x3d   :  { %v463_v8 = vld [vmem:[%s3418_s0 + $0x4] sm:$0xff]  ;;  %v464_v9 = vld [vmem:[%s3418_s0 + $0xc] sm:$0xff]  ;;  %v465_v10 = vld [vmem:[%s3418_s0 + $0x14] sm:$0xff] }
  0x3e   :  { %509 = vmatpush.msra.mxu0 %v1752_v44  ;;  %538 = vmatpush.msra.mxu1 %v1753_v45  ;;  %v466_v11 = vld [vmem:[%s3418_s0 + $0x1c] sm:$0xf] }
  0x40   :  { %510 = vmatpush.msra.mxu0 %v1750_v46  ;;  %539 = vmatpush.msra.mxu1 %v1751_v47  ;;  %v669_v46 = vld [vmem:[%s3422_s4 + $0x78] sm:$0xff]  ;;  %v668_v47 = vld [vmem:[%s3422_s4 + $0x70] sm:$0xff] }
  0x42   :  { %1693 = vmatmul.msk.f32.gmra.mxu0 %vm108_vm0, %v250_v48  ;;  %1697 = vmatmul.msk.f32.gmra.mxu1 %vm108_vm0, %v250_v48 }
  0x43   :  { %1725 = vmatmul.msk.f32.gmra.mxu2 %vm108_vm0, %v357_v49  ;;  %1729 = vmatmul.msk.f32.gmra.mxu3 %vm108_vm0, %v357_v49 }
  0x44   :  { %511 = vmatpush.msra.mxu0 %v1748_v50  ;;  %540 = vmatpush.msra.mxu1 %v1749_v51  ;;  %v667_v50 = vld [vmem:[%s3422_s4 + $0x68] sm:$0xff] }
  0x46   :  { %512 = vmatpush.msra.mxu0 %v1746_v52  ;;  %541 = vmatpush.msra.mxu1 %v1747_v53 }
  0x48   :  { %513 = vmatpush.msra.mxu0 %v1744_v54  ;;  %542 = vmatpush.msra.mxu1 %v1745_v55  ;;  %v666_v55 = vld [vmem:[%s3422_s4 + $0x60] sm:$0xff] }
  0x4a   :  { %1694 = vmatmul.msk.f32.gmra.mxu0 %vm108_vm0, %v251_v56  ;;  %1698 = vmatmul.msk.f32.gmra.mxu1 %vm108_vm0, %v251_v56 }
  0x4b   :  { %1726 = vmatmul.msk.f32.gmra.mxu2 %vm108_vm0, %v358_v57  ;;  %1730 = vmatmul.msk.f32.gmra.mxu3 %vm108_vm0, %v358_v57 }
  0x4c   :  { %514 = vmatpush.msra.mxu0 %v1742_v58  ;;  %543 = vmatpush.msra.mxu1 %v1743_v59 }
  0x4e   :  { %515 = vmatpush.msra.mxu0 %v1740_v60  ;;  %544 = vmatpush.msra.mxu1 %v1741_v61 }
  0x50   :  { %516 = vmatpush.msra.mxu0 %v1738_v62  ;;  %545 = vmatpush.msra.mxu1 %v1739_v63 }
  0x52   :  { %1695 = vmatmul.msk.f32.gmra.mxu0 %vm108_vm0, %v252_v0  ;;  %1699 = vmatmul.msk.f32.gmra.mxu1 %vm108_vm0, %v252_v0 }
  0x53   :  { %1727 = vmatmul.msk.f32.gmra.mxu2 %vm108_vm0, %v359_v1  ;;  %1731 = vmatmul.msk.f32.gmra.mxu3 %vm108_vm0, %v359_v1 }
  0x54   :  { %517 = vmatpush.msra.mxu0 %v1736_v2  ;;  %546 = vmatpush.msra.mxu1 %v1737_v3  ;;  %v665_v2 = vld [vmem:[%s3422_s4 + $0x58] sm:$0xff] }
  0x56   :  { %518 = vmatpush.msra.mxu0 %v1734_v4  ;;  %547 = vmatpush.msra.mxu1 %v1735_v5 }
  0x58   :  { %519 = vmatpush.msra.mxu0 %v1732_v6  ;;  %548 = vmatpush.msra.mxu1 %v1733_v7  ;;  %v570_v7 = vld [vmem:[%s3420_s2] sm:$0x3] }
  0x5a   :  { %1756 = vmatmul.msk.f32.vlgmr.msra.gmra.mxu0 %vm108_vm0, %v463_v8  ;;  %1760 = vmatmul.msk.f32.vlgmr.msra.gmra.mxu1 %vm108_vm0, %v463_v8 }
  0x5b   :  { %682 = vmatpush.msrb.mxu0 %v669_v46 }
  0x5d   :  { %683 = vmatpush.msrb.mxu0 %v668_v47  ;;  %v659_v47 = vld [vmem:[%s3422_s4 + $0x28] sm:$0xff] }
  0x5f   :  { %684 = vmatpush.msrb.mxu0 %v667_v50  ;;  %v592_v50 = vld [vmem:[%s3421_s3] sm:$0xff] }
  0x61   :  { %685 = vmatpush.msrb.mxu0 %v666_v55  ;;  %v671_v55 = vld [vmem:[%s3422_s4 + $0x88] sm:$0xff] }
  0x62   :  { %1757 = vmatmul.msk.f32.gmra.mxu0 %vm108_vm0, %v464_v9  ;;  %1761 = vmatmul.msk.f32.gmra.mxu1 %vm108_vm0, %v464_v9 }
  0x63   :  { %686 = vmatpush.msrb.mxu0 %v665_v2  ;;  %v1792_v2 = vld [vmem:[%s3423_s5 + $0x160] sm:$0xff] }
  0x6a   :  { %1758 = vmatmul.msk.f32.gmra.mxu0 %vm108_vm0, %v465_v10  ;;  %1762 = vmatmul.msk.f32.gmra.mxu1 %vm108_vm0, %v465_v10 }
  0x72   :  { %1759 = vmatmul.msk.f32.gmra.mxu0 %vm108_vm0, %v466_v11  ;;  %1763 = vmatmul.msk.f32.gmra.mxu1 %vm108_vm0, %v466_v11 }
  0x97   :  { %v138_v12 = vpop.f32.mrf.mxu0  ;;  %v167_v13 = vpop.f32.mrf.mxu1 }
  0x9e   :  { %v208_v16 = vpop.f32.mrf.mxu2  ;;  %v237_v17 = vpop.f32.mrf.mxu3 }
  0x9f   :  { %v141_v14 = vpop.f32.mrf.mxu0  ;;  %v170_v15 = vpop.f32.mrf.mxu1  ;;  %v209_v60 = vadd.f32 %v208_v16, %v138_v12  ;;  %v238_v61 = vadd.f32 %v237_v17, %v167_v13  ;;  %v664_v12 = vld [vmem:[%s3422_s4 + $0x50] sm:$0xff] }
  0xa0   :  { %687 = vmatpush.msrb.mxu0 %v664_v12  ;;  %v742_v12 = vld [vmem:[%s3423_s5 + $0x70] sm:$0xff] }
  0xa6   :  { %v211_v20 = vpop.f32.mrf.mxu2  ;;  %v240_v21 = vpop.f32.mrf.mxu3 }
  0xa7   :  { %v144_v18 = vpop.f32.mrf.mxu0  ;;  %v173_v19 = vpop.f32.mrf.mxu1  ;;  %v212_v53 = vadd.f32 %v211_v20, %v141_v14  ;;  %v241_v54 = vadd.f32 %v240_v21, %v170_v15  ;;  %v573_v20 = vperm.slane %v570_v7, 1 }
  0xae   :  { %v214_v26 = vpop.f32.mrf.mxu2  ;;  %v243_v27 = vpop.f32.mrf.mxu3 }
  0xaf   :  { %v147_v22 = vpop.f32.mrf.mxu0  ;;  %v176_v23 = vpop.f32.mrf.mxu1  ;;  %v215_v51 = vadd.f32 %v214_v26, %v144_v18  ;;  %v244_v52 = vadd.f32 %v243_v27, %v173_v19  ;;  %v572_v19 = vperm.slane %v570_v7, 0  ;;  %v744_v7 = vld [vmem:[%s3423_s5 + $0x80] sm:$0xff] }
  0xb6   :  { %v217_v30 = vpop.f32.mrf.mxu2  ;;  %v246_v31 = vpop.f32.mrf.mxu3 }
  0xb7   :  { %v307_v24 = vpop.f32.mrf.mxu0  ;;  %v336_v25 = vpop.f32.mrf.mxu1  ;;  %v218_v56 = vadd.f32 %v217_v30, %v147_v22  ;;  %v247_v57 = vadd.f32 %v246_v31, %v176_v23  ;;  %v663_v23 = vld [vmem:[%s3422_s4 + $0x48] sm:$0xff]  ;;  %v662_v30 = vld [vmem:[%s3422_s4 + $0x40] sm:$0xff] }
  0xb8   :  { %v348_v8 = vadd.f32 %v307_v24, %v209_v60  ;;  %v349_v9 = vadd.f32 %v336_v25, %v238_v61  ;;  %688 = vmatpush.msrb.mxu0 %v663_v23  ;;  %v655_v60 = vld [vmem:[%s3422_s4 + $0x8] sm:$0xff]  ;;  %v654_v61 = vld [vmem:[%s3422_s4] sm:$0xff]  ;;  %v1822_v23 = vld [vmem:[%s3423_s5 + $0x1f0] sm:$0xff] }
  0xba   :  { %689 = vmatpush.msrb.mxu0 %v662_v30  ;;  %v1779_v30 = vld [vmem:[%s3423_s5 + $0xf8] sm:$0xff] }
  0xbe   :  { %v414_v34 = vpop.f32.mrf.mxu2  ;;  %v443_v35 = vpop.f32.mrf.mxu3 }
  0xbf   :  { %v310_v28 = vpop.f32.mrf.mxu0  ;;  %v339_v29 = vpop.f32.mrf.mxu1  ;;  %v455_v17 = vadd.f32 %v414_v34, %v348_v8  ;;  %v456_v18 = vadd.f32 %v443_v35, %v349_v9  ;;  %v1788_v8 = vld [vmem:[%s3423_s5 + $0x140] sm:$0xff]  ;;  %v1830_v9 = vld [vmem:[%s3423_s5 + $0x230] sm:$0x3] }
  0xc0   :  { %v350_v62 = vadd.f32 %v310_v28, %v212_v53  ;;  %v351_v63 = vadd.f32 %v339_v29, %v241_v54  ;;  %v673_v53 = vld [vmem:[%s3422_s4 + $0x98] sm:$0xff]  ;;  %v672_v54 = vld [vmem:[%s3422_s4 + $0x90] sm:$0xff] }
  0xc6   :  { %v417_v38 = vpop.f32.mrf.mxu2  ;;  %v446_v39 = vpop.f32.mrf.mxu3 }
  0xc7   :  { %v313_v32 = vpop.f32.mrf.mxu0  ;;  %v342_v33 = vpop.f32.mrf.mxu1  ;;  %v457_v10 = vadd.f32 %v417_v38, %v350_v62  ;;  %v458_v11 = vadd.f32 %v446_v39, %v351_v63  ;;  %v661_v39 = vld [vmem:[%s3422_s4 + $0x38] sm:$0xff]  ;;  %v750_v62 = vld [vmem:[%s3423_s5 + $0xb0] sm:$0x3] }
  0xc8   :  { %v352_v58 = vadd.f32 %v313_v32, %v215_v51  ;;  %v353_v59 = vadd.f32 %v342_v33, %v244_v52  ;;  %690 = vmatpush.msrb.mxu0 %v661_v39  ;;  %v674_v51 = vld [vmem:[%s3422_s4 + $0xa0] sm:$0xff]  ;;  %v1794_v63 = vld [vmem:[%s3423_s5 + $0x170] sm:$0x3] }
  0xc9   :  { %v658_v52 = vld [vmem:[%s3422_s4 + $0x20] sm:$0xff] }
  0xca   :  { %v728_v39 = vld [vmem:[%s3423_s5] sm:$0xff] }
  0xce   :  { %v420_v44 = vpop.f32.mrf.mxu2  ;;  %v449_v45 = vpop.f32.mrf.mxu3 }
  0xcf   :  { %v316_v36 = vpop.f32.mrf.mxu0  ;;  %v345_v37 = vpop.f32.mrf.mxu1  ;;  %v459_v3 = vadd.f32 %v420_v44, %v352_v58  ;;  %v460_v4 = vadd.f32 %v449_v45, %v353_v59  ;;  %v660_v44 = vld [vmem:[%s3422_s4 + $0x30] sm:$0xff]  ;;  %v670_v58 = vld [vmem:[%s3422_s4 + $0x80] sm:$0xff] }
  0xd0   :  { %v354_v5 = vadd.f32 %v316_v36, %v218_v56  ;;  %v355_v6 = vadd.f32 %v345_v37, %v247_v57  ;;  %691 = vmatpush.msrb.mxu0 %v660_v44  ;;  %v593_v56 = vld [vmem:[%s3421_s3 + $0x8] sm:$0x7f]  ;;  %v657_v57 = vld [vmem:[%s3422_s4 + $0x18] sm:$0xff]  ;;  %v656_v59 = vld [vmem:[%s3422_s4 + $0x10] sm:$0xff] }
  0xd2   :  { %692 = vmatpush.msrb.mxu0 %v659_v47  ;;  %v1858_v47 = vld [vmem:[%s3423_s5 + $0x2e0] sm:$0xff] }
  0xd4   :  { %693 = vmatpush.msrb.mxu0 %v658_v52  ;;  %v1812_v52 = vld [vmem:[%s3423_s5 + $0x1a0] sm:$0xff] }
  0xd6   :  { %v423_v0 = vpop.f32.mrf.mxu2  ;;  %v452_v1 = vpop.f32.mrf.mxu3  ;;  %694 = vmatpush.msrb.mxu0 %v657_v57  ;;  %v1827_v57 = vld [vmem:[%s3423_s5 + $0x218] sm:$0xff] }
  0xd7   :  { %v521_v40 = vpop.f32.mrf.mxu0  ;;  %v550_v41 = vpop.f32.mrf.mxu1  ;;  %v461_v13 = vadd.f32 %v423_v0, %v354_v5  ;;  %v462_v14 = vadd.f32 %v452_v1, %v355_v6  ;;  %v748_v0 = vld [vmem:[%s3423_s5 + $0xa0] sm:$0xff]  ;;  %v1795_v1 = vld [vmem:[%s3423_s5 + $0x178] sm:$0x3]  ;;  %v1790_v5 = vld [vmem:[%s3423_s5 + $0x150] sm:$0xff] }
  0xd8   :  { %v562_v28 = vadd.f32 %v521_v40, %v455_v17  ;;  %v563_v29 = vadd.f32 %v550_v41, %v456_v18  ;;  %695 = vmatpush.msrb.mxu0 %v656_v59  ;;  %1799 = vmatpush.msk.msrb.mxu1 %vm788_vm3, %v1795_v1  ;;  %v1791_v6 = vld [vmem:[%s3423_s5 + $0x158] sm:$0xff]  ;;  %v1784_v17 = vld [vmem:[%s3423_s5 + $0x120] sm:$0xff]  ;;  %v1785_v18 = vld [vmem:[%s3423_s5 + $0x128] sm:$0xff] }
  0xd9   :  { %v745_v59 = vld [vmem:[%s3423_s5 + $0x88] sm:$0xff]  ;;  %v743_v1 = vld [vmem:[%s3423_s5 + $0x78] sm:$0xff] }
  0xda   :  { %v576_v40 = vadd.f32 %v572_v19, %v562_v28  ;;  %v577_v41 = vadd.f32 %v573_v20, %v563_v29  ;;  %696 = vmatpush.msrb.mxu0 %v655_v60  ;;  %v734_v28 = vld [vmem:[%s3423_s5 + $0x30] sm:$0xff]  ;;  %v1808_v60 = vld [vmem:[%s3423_s5 + $0x180] sm:$0xff] }
  0xdb   :  { %v1778_v29 = vld [vmem:[%s3423_s5 + $0xf0] sm:$0xff] }
  0xdc   :  { %697 = vmatpush.msrb.mxu0 %v654_v61  ;;  %v1825_v61 = vld [vmem:[%s3423_s5 + $0x208] sm:$0xff] }
  0xde   :  { %1832 = vmatpush.msk.msra.mxu0 %vm788_vm3, %v1830_v9  ;;  %v1819_v9 = vld [vmem:[%s3423_s5 + $0x1d8] sm:$0xff] }
  0xdf   :  { %v524_v42 = vpop.f32.mrf.mxu0  ;;  %v553_v43 = vpop.f32.mrf.mxu1 }
  0xe0   :  { %v564_v24 = vadd.f32 %v524_v42, %v457_v10  ;;  %v565_v25 = vadd.f32 %v553_v43, %v458_v11  ;;  %v1789_v10 = vld [vmem:[%s3423_s5 + $0x148] sm:$0xff]  ;;  %v1828_v11 = vld [vmem:[%s3423_s5 + $0x220] sm:$0xff] }
  0xe1   :  { %941 = vmatpush.msra.mxu0 %v1828_v11  ;;  %v1884_v11 = vld [vmem:[%s3423_s5 + $0x380] sm:$0xff] }
  0xe2   :  { %v578_v35 = vadd.f32 %v572_v19, %v564_v24  ;;  %v579_v36 = vadd.f32 %v573_v20, %v565_v25  ;;  %v736_v24 = vld [vmem:[%s3423_s5 + $0x40] sm:$0xff] }
  0xe3   :  { %v1780_v25 = vld [vmem:[%s3423_s5 + $0x100] sm:$0xff] }
  0xe4   :  { %v586_v45 = vmax.f32 %v578_v35, 0.0  ;;  %v587_v46 = vmax.f32 %v579_v36, 0.0  ;;  %v1816_v35 = vld [vmem:[%s3423_s5 + $0x1c0] sm:$0xff]  ;;  %v730_v36 = vld [vmem:[%s3423_s5 + $0x10] sm:$0xff] }
  0xe7   :  { %v527_v48 = vpop.f32.mrf.mxu0  ;;  %v556_v49 = vpop.f32.mrf.mxu1 }
  0xe8   :  { %v566_v15 = vadd.f32 %v527_v48, %v459_v3  ;;  %v567_v16 = vadd.f32 %v556_v49, %v460_v4  ;;  %v584_v48 = vmax.f32 %v576_v40, 0.0  ;;  %v585_v49 = vmax.f32 %v577_v41, 0.0  ;;  %v1793_v3 = vld [vmem:[%s3423_s5 + $0x168] sm:$0xff]  ;;  %v746_v4 = vld [vmem:[%s3423_s5 + $0x90] sm:$0xff]  ;;  %v1772_v40 = vld [vmem:[%s3423_s5 + $0xc0] sm:$0xff] }
  0xe9   :  { %823 = vmatpush.msrb.mxu1 %v1793_v3  ;;  %v1860_v41 = vld [vmem:[%s3423_s5 + $0x2f0] sm:$0x3] }
  0xea   :  { %v580_v31 = vadd.f32 %v572_v19, %v566_v15  ;;  %v581_v32 = vadd.f32 %v573_v20, %v567_v16  ;;  %v1826_v15 = vld [vmem:[%s3423_s5 + $0x210] sm:$0xff]  ;;  %v740_v16 = vld [vmem:[%s3423_s5 + $0x60] sm:$0xff] }
  0xeb   :  { %824 = vmatpush.msrb.mxu1 %v1791_v6  ;;  %942 = vmatpush.msra.mxu0 %v1826_v15  ;;  %v1848_v3 = vld [vmem:[%s3423_s5 + $0x290] sm:$0xff]  ;;  %v1821_v6 = vld [vmem:[%s3423_s5 + $0x1e8] sm:$0xff]  ;;  %v1842_v15 = vld [vmem:[%s3423_s5 + $0x260] sm:$0xff] }
  0xec   :  { %v588_v42 = vmax.f32 %v580_v31, 0.0  ;;  %v589_v43 = vmax.f32 %v581_v32, 0.0  ;;  %v1818_v31 = vld [vmem:[%s3423_s5 + $0x1d0] sm:$0xff]  ;;  %v732_v32 = vld [vmem:[%s3423_s5 + $0x20] sm:$0xff] }
  0xed   :  { %825 = vmatpush.msrb.mxu1 %v1789_v10  ;;  %v1846_v10 = vld [vmem:[%s3423_s5 + $0x280] sm:$0xff] }
  0xef   :  { %v530_v21 = vpop.f32.mrf.mxu0  ;;  %v559_v22 = vpop.f32.mrf.mxu1 }
  0xf0   :  { %v568_v26 = vadd.f32 %v530_v21, %v461_v13  ;;  %v569_v27 = vadd.f32 %v559_v22, %v462_v14  ;;  %v1786_v13 = vld [vmem:[%s3423_s5 + $0x130] sm:$0xff]  ;;  %v1787_v14 = vld [vmem:[%s3423_s5 + $0x138] sm:$0xff] }
  0xf1   :  { %826 = vmatpush.msrb.mxu1 %v1787_v14  ;;  %v1782_v21 = vld [vmem:[%s3423_s5 + $0x110] sm:$0xff]  ;;  %v1783_v22 = vld [vmem:[%s3423_s5 + $0x118] sm:$0xff]  ;;  %v1817_v14 = vld [vmem:[%s3423_s5 + $0x1c8] sm:$0xff] }
  0xf2   :  { %v582_v33 = vadd.f32 %v572_v19, %v568_v26  ;;  %v583_v34 = vadd.f32 %v573_v20, %v569_v27  ;;  %v1824_v19 = vld [vmem:[%s3423_s5 + $0x200] sm:$0xff]  ;;  %v738_v20 = vld [vmem:[%s3423_s5 + $0x50] sm:$0xff]  ;;  %v1781_v26 = vld [vmem:[%s3423_s5 + $0x108] sm:$0xff] }
  0xf3   :  { %827 = vmatpush.msrb.mxu1 %v1785_v18  ;;  %943 = vmatpush.msra.mxu0 %v1824_v19  ;;  %v1820_v27 = vld [vmem:[%s3423_s5 + $0x1e0] sm:$0xff]  ;;  %v1815_v18 = vld [vmem:[%s3423_s5 + $0x1b8] sm:$0xff] }
  0xf4   :  { %v590_v37 = vmax.f32 %v582_v33, 0.0  ;;  %v591_v38 = vmax.f32 %v583_v34, 0.0  ;;  %v1776_v33 = vld [vmem:[%s3423_s5 + $0xe0] sm:$0xff]  ;;  %v1777_v34 = vld [vmem:[%s3423_s5 + $0xe8] sm:$0xff] }
  0xf5   :  { %828 = vmatpush.msrb.mxu1 %v1783_v22  ;;  %944 = vmatpush.msra.mxu0 %v1822_v23  ;;  %v1880_v19 = vld [vmem:[%s3423_s5 + $0x360] sm:$0xff]  ;;  %v1840_v22 = vld [vmem:[%s3423_s5 + $0x250] sm:$0xff] }
  0xf6   :  { %1764 = vmatpush.msk.msra.mxu2 %vm601_vm1, %v590_v37  ;;  %1767 = vmatpush.msk.msra.mxu3 %vm601_vm1, %v591_v38  ;;  %v1774_v37 = vld [vmem:[%s3423_s5 + $0xd0] sm:$0xff]  ;;  %v1775_v38 = vld [vmem:[%s3423_s5 + $0xd8] sm:$0xff] }
  0xf7   :  { %829 = vmatpush.msrb.mxu1 %v1781_v26  ;;  %945 = vmatpush.msra.mxu0 %v1820_v27  ;;  %v1878_v23 = vld [vmem:[%s3423_s5 + $0x350] sm:$0xff]  ;;  %v1838_v26 = vld [vmem:[%s3423_s5 + $0x240] sm:$0xff] }
  0xf8   :  { %621 = vmatpush.msra.mxu2 %v588_v42  ;;  %644 = vmatpush.msra.mxu3 %v589_v43  ;;  %v1773_v42 = vld [vmem:[%s3423_s5 + $0xc8] sm:$0xff]  ;;  %v1876_v27 = vld [vmem:[%s3423_s5 + $0x340] sm:$0xff] }
  0xf9   :  { %830 = vmatpush.msrb.mxu1 %v1779_v30  ;;  %946 = vmatpush.msra.mxu0 %v1818_v31  ;;  %v1874_v30 = vld [vmem:[%s3423_s5 + $0x330] sm:$0xff]  ;;  %v1872_v31 = vld [vmem:[%s3423_s5 + $0x320] sm:$0xff] }
  0xfa   :  { %622 = vmatpush.msra.mxu2 %v586_v45  ;;  %645 = vmatpush.msra.mxu3 %v587_v46 }
  0xfb   :  { %831 = vmatpush.msrb.mxu1 %v1777_v34  ;;  %947 = vmatpush.msra.mxu0 %v1816_v35  ;;  %v1868_v34 = vld [vmem:[%s3423_s5 + $0x300] sm:$0xff] }
  0xfc   :  { %623 = vmatpush.msra.mxu2 %v584_v48  ;;  %646 = vmatpush.msra.mxu3 %v585_v49  ;;  %v751_v48 = vld [vmem:[%s3423_s5 + $0xb8] sm:$0x3]  ;;  %v1814_v49 = vld [vmem:[%s3423_s5 + $0x1b0] sm:$0xff] }
  0xfd   :  { %1768 = vmatmul.msk.f32.vlgmr.msra.gmra.mxu3 %vm594_vm2, %v592_v50  ;;  %1765 = vmatmul.msk.f32.vlgmr.msra.gmra.mxu2 %vm594_vm2, %v592_v50  ;;  %v1831_v50 = vld [vmem:[%s3423_s5 + $0x238] sm:$0x3] }
  0xfe   :  { %716 = vmatpush.msrb.mxu2 %v674_v51  ;;  %1796 = vmatpush.msk.msrb.mxu3 %vm788_vm3, %v1794_v63  ;;  %v749_v51 = vld [vmem:[%s3423_s5 + $0xa8] sm:$0xff]  ;;  %v1890_v63 = vld [vmem:[%s3423_s5 + $0x3b0] sm:$0x3] }
  0xff   :  { %832 = vmatpush.msrb.mxu1 %v1775_v38  ;;  %948 = vmatpush.msra.mxu0 %v1814_v49  ;;  %v1859_v49 = vld [vmem:[%s3423_s5 + $0x2e8] sm:$0xff] }
 0x100   :  { %717 = vmatpush.msrb.mxu2 %v673_v53  ;;  %800 = vmatpush.msrb.mxu3 %v1792_v2  ;;  %v1829_v53 = vld [vmem:[%s3423_s5 + $0x228] sm:$0xff]  ;;  %v1823_v2 = vld [vmem:[%s3423_s5 + $0x1f8] sm:$0xff] }
 0x101   :  { %833 = vmatpush.msrb.mxu1 %v1773_v42  ;;  %949 = vmatpush.msra.mxu0 %v1812_v52  ;;  %v1857_v52 = vld [vmem:[%s3423_s5 + $0x2d8] sm:$0xff] }
 0x102   :  { %718 = vmatpush.msrb.mxu2 %v672_v54  ;;  %801 = vmatpush.msrb.mxu3 %v1790_v5  ;;  %v1856_v54 = vld [vmem:[%s3423_s5 + $0x2d0] sm:$0xff]  ;;  %v741_v5 = vld [vmem:[%s3423_s5 + $0x68] sm:$0xff] }
 0x103   :  { %1835 = vmatpush.msk.msra.mxu1 %vm788_vm3, %v1831_v50  ;;  %v1889_v50 = vld [vmem:[%s3423_s5 + $0x3a8] sm:$0xff] }
 0x104   :  { %719 = vmatpush.msrb.mxu2 %v671_v55  ;;  %802 = vmatpush.msrb.mxu3 %v1788_v8  ;;  %v747_v55 = vld [vmem:[%s3423_s5 + $0x98] sm:$0xff] }
 0x105   :  { %1769 = vmatmul.msk.f32.gmra.mxu3 %vm594_vm2, %v593_v56  ;;  %1766 = vmatmul.msk.f32.gmra.mxu2 %vm594_vm2, %v593_v56  ;;  %v1810_v56 = vld [vmem:[%s3423_s5 + $0x190] sm:$0xff]  ;;  %v739_v8 = vld [vmem:[%s3423_s5 + $0x58] sm:$0xff]  ;;  %vm1610_vm2 = vcmask 0  }
 0x106   :  { %720 = vmatpush.msrb.mxu2 %v670_v58  ;;  %803 = vmatpush.msrb.mxu3 %v1786_v13  ;;  %v1854_v58 = vld [vmem:[%s3423_s5 + $0x2c0] sm:$0xff]  ;;  %v737_v13 = vld [vmem:[%s3423_s5 + $0x48] sm:$0xff] }
 0x107   :  { %964 = vmatpush.msra.mxu1 %v1829_v53  ;;  %950 = vmatpush.msra.mxu0 %v1810_v56  ;;  %v1887_v53 = vld [vmem:[%s3423_s5 + $0x398] sm:$0xff]  ;;  %v1885_v56 = vld [vmem:[%s3423_s5 + $0x388] sm:$0xff] }
 0x108   :  { %1802 = vmatpush.msk.msra.mxu2 %vm788_vm3, %v750_v62  ;;  %804 = vmatpush.msrb.mxu3 %v1784_v17  ;;  %v1852_v62 = vld [vmem:[%s3423_s5 + $0x2b0] sm:$0xff]  ;;  %v735_v17 = vld [vmem:[%s3423_s5 + $0x38] sm:$0xff] }
 0x109   :  { %965 = vmatpush.msra.mxu1 %v1827_v57  ;;  %951 = vmatpush.msra.mxu0 %v1808_v60  ;;  %v1853_v57 = vld [vmem:[%s3423_s5 + $0x2b8] sm:$0xff]  ;;  %v1881_v60 = vld [vmem:[%s3423_s5 + $0x368] sm:$0xff] }
 0x10a   :  { %856 = vmatpush.msra.mxu2 %v748_v0  ;;  %805 = vmatpush.msrb.mxu3 %v1782_v21  ;;  %v1850_v0 = vld [vmem:[%s3423_s5 + $0x2a0] sm:$0xff]  ;;  %v1813_v21 = vld [vmem:[%s3423_s5 + $0x1a8] sm:$0xff] }
 0x10b   :  { %966 = vmatpush.msra.mxu1 %v1825_v61  ;;  %v1849_v61 = vld [vmem:[%s3423_s5 + $0x298] sm:$0xff] }
 0x10c   :  { %857 = vmatpush.msra.mxu2 %v746_v4  ;;  %806 = vmatpush.msrb.mxu3 %v1780_v25  ;;  %v1888_v4 = vld [vmem:[%s3423_s5 + $0x3a0] sm:$0xff]  ;;  %v1811_v25 = vld [vmem:[%s3423_s5 + $0x198] sm:$0xff] }
 0x10d   :  { %967 = vmatpush.msra.mxu1 %v1823_v2  ;;  %v1877_v2 = vld [vmem:[%s3423_s5 + $0x348] sm:$0xff] }
 0x10e   :  { %858 = vmatpush.msra.mxu2 %v744_v7  ;;  %807 = vmatpush.msrb.mxu3 %v1778_v29  ;;  %v1886_v7 = vld [vmem:[%s3423_s5 + $0x390] sm:$0xff]  ;;  %v1809_v29 = vld [vmem:[%s3423_s5 + $0x188] sm:$0xff] }
 0x10f   :  { %968 = vmatpush.msra.mxu1 %v1821_v6  ;;  %v1843_v6 = vld [vmem:[%s3423_s5 + $0x268] sm:$0xff] }
 0x110   :  { %859 = vmatpush.msra.mxu2 %v742_v12  ;;  %808 = vmatpush.msrb.mxu3 %v1776_v33  ;;  %v1844_v12 = vld [vmem:[%s3423_s5 + $0x270] sm:$0xff] }
 0x111   :  { %969 = vmatpush.msra.mxu1 %v1819_v9  ;;  %v1871_v9 = vld [vmem:[%s3423_s5 + $0x318] sm:$0xff] }
 0x112   :  { %860 = vmatpush.msra.mxu2 %v740_v16  ;;  %809 = vmatpush.msrb.mxu3 %v1774_v37  ;;  %v1882_v16 = vld [vmem:[%s3423_s5 + $0x370] sm:$0xff] }
 0x113   :  { %970 = vmatpush.msra.mxu1 %v1817_v14 }
 0x114   :  { %861 = vmatpush.msra.mxu2 %v738_v20  ;;  %810 = vmatpush.msrb.mxu3 %v1772_v40  ;;  %v733_v20 = vld [vmem:[%s3423_s5 + $0x28] sm:$0xff] }
 0x115   :  { %971 = vmatpush.msra.mxu1 %v1815_v18 }
 0x116   :  { %862 = vmatpush.msra.mxu2 %v736_v24  ;;  %1805 = vmatpush.msk.msra.mxu3 %vm788_vm3, %v751_v48  ;;  %v731_v24 = vld [vmem:[%s3423_s5 + $0x18] sm:$0xff] }
 0x117   :  { %972 = vmatpush.msra.mxu1 %v1813_v21 }
 0x118   :  { %863 = vmatpush.msra.mxu2 %v734_v28  ;;  %879 = vmatpush.msra.mxu3 %v749_v51  ;;  %v729_v28 = vld [vmem:[%s3423_s5 + $0x8] sm:$0xff] }
 0x119   :  { %973 = vmatpush.msra.mxu1 %v1811_v25 }
 0x11a   :  { %864 = vmatpush.msra.mxu2 %v732_v32  ;;  %880 = vmatpush.msra.mxu3 %v747_v55  ;;  %v1870_v32 = vld [vmem:[%s3423_s5 + $0x310] sm:$0xff]  ;;  %v1855_v55 = vld [vmem:[%s3423_s5 + $0x2c8] sm:$0xff] }
 0x11b   :  { %974 = vmatpush.msra.mxu1 %v1809_v29 }
 0x11c   :  { %865 = vmatpush.msra.mxu2 %v730_v36  ;;  %881 = vmatpush.msra.mxu3 %v745_v59  ;;  %v1851_v59 = vld [vmem:[%s3423_s5 + $0x2a8] sm:$0xff] }
 0x11e   :  { %866 = vmatpush.msra.mxu2 %v728_v39  ;;  %882 = vmatpush.msra.mxu3 %v743_v1  ;;  %v1847_v1 = vld [vmem:[%s3423_s5 + $0x288] sm:$0xff] }
 0x120   :  { %883 = vmatpush.msra.mxu3 %v741_v5  ;;  %v1875_v5 = vld [vmem:[%s3423_s5 + $0x338] sm:$0xff] }
 0x122   :  { %884 = vmatpush.msra.mxu3 %v739_v8  ;;  %v1841_v8 = vld [vmem:[%s3423_s5 + $0x258] sm:$0xff] }
 0x124   :  { %885 = vmatpush.msra.mxu3 %v737_v13 }
 0x126   :  { %886 = vmatpush.msra.mxu3 %v735_v17 }
 0x128   :  { %887 = vmatpush.msra.mxu3 %v733_v20 }
 0x12a   :  { %888 = vmatpush.msra.mxu3 %v731_v24 }
 0x12c   :  { %889 = vmatpush.msra.mxu3 %v729_v28 }
 0x180   :  { %v648_v43 = vpop.f32.mrf.mxu3  ;;  %v625_v44 = vpop.f32.mrf.mxu2 }
 0x181   :  { %1770 = vmatmul.msk.f32.vlgmr.msrb.gmra.mxu2 %vm675_vm4, %v648_v43  ;;  %698 = vmatmul.f32.vlgmr.msrb.gmra.mxu0 %v625_v44  ;;  %v1861_v44 = vld [vmem:[%s3423_s5 + $0x2f8] sm:$0x3] }
 0x182   :  { %1862 = vmatpush.msk.msrb.mxu2 %vm788_vm3, %v1860_v41  ;;  %1892 = vmatpush.msk.msrb.mxu0 %vm788_vm3, %v1890_v63  ;;  %v1879_v63 = vld [vmem:[%s3423_s5 + $0x358] sm:$0xff] }
 0x184   :  { %1030 = vmatpush.msrb.mxu2 %v1858_v47  ;;  %1118 = vmatpush.msrb.mxu0 %v1888_v4  ;;  %v1891_v47 = vld [vmem:[%s3423_s5 + $0x3b8] sm:$0x3] }
 0x185   :  { %v1845_v4 = vld [vmem:[%s3423_s5 + $0x278] sm:$0xff] }
 0x186   :  { %1031 = vmatpush.msrb.mxu2 %v1856_v54  ;;  %1119 = vmatpush.msrb.mxu0 %v1886_v7  ;;  %v1873_v7 = vld [vmem:[%s3423_s5 + $0x328] sm:$0xff] }
 0x188   :  { %v651_v45 = vpop.f32.mrf.mxu3  ;;  %v628_v46 = vpop.f32.mrf.mxu2  ;;  %1032 = vmatpush.msrb.mxu2 %v1854_v58  ;;  %1120 = vmatpush.msrb.mxu0 %v1884_v11  ;;  %v1883_v58 = vld [vmem:[%s3423_s5 + $0x378] sm:$0xff]  ;;  %v1869_v11 = vld [vmem:[%s3423_s5 + $0x308] sm:$0xff] }
 0x189   :  { %1771 = vmatmul.msk.f32.gmra.mxu2 %vm675_vm4, %v651_v45  ;;  %701 = vmatmul.f32.gmra.mxu0 %v628_v46 }
 0x18a   :  { %1033 = vmatpush.msrb.mxu2 %v1852_v62  ;;  %1121 = vmatpush.msrb.mxu0 %v1882_v16 }
 0x18c   :  { %1034 = vmatpush.msrb.mxu2 %v1850_v0  ;;  %1122 = vmatpush.msrb.mxu0 %v1880_v19 }
 0x18e   :  { %1035 = vmatpush.msrb.mxu2 %v1848_v3  ;;  %1123 = vmatpush.msrb.mxu0 %v1878_v23 }
 0x190   :  { %1036 = vmatpush.msrb.mxu2 %v1846_v10  ;;  %1124 = vmatpush.msrb.mxu0 %v1876_v27  ;;  %v1839_v10 = vld [vmem:[%s3423_s5 + $0x248] sm:$0xff]  ;;  %v1163_v27 = vld [vmem:[%s3424_s6] sm:$0x3] }
 0x192   :  { %1037 = vmatpush.msrb.mxu2 %v1844_v12  ;;  %1125 = vmatpush.msrb.mxu0 %v1874_v30 }
 0x194   :  { %1038 = vmatpush.msrb.mxu2 %v1842_v15  ;;  %1126 = vmatpush.msrb.mxu0 %v1872_v31 }
 0x196   :  { %1039 = vmatpush.msrb.mxu2 %v1840_v22  ;;  %1127 = vmatpush.msrb.mxu0 %v1870_v32  ;;  %v1165_v32 = vperm.slane %v1163_v27, 0 }
 0x198   :  { %1040 = vmatpush.msrb.mxu2 %v1838_v26  ;;  %1128 = vmatpush.msrb.mxu0 %v1868_v34 }
 0x1fe   :  { %v699_v33 = vpop.f32.mrf.mxu0 }
 0x204   :  { %v722_v35 = vpop.f32.mrf.mxu2 }
 0x205   :  { %v723_v36 = vadd.f32 %v722_v35, %v699_v33 }
 0x206   :  { %v702_v37 = vpop.f32.mrf.mxu0 }
 0x207   :  { %1803 = vmatmul.msk.f32.vlgmr.msra.gmra.mxu2 %vm783_vm5, %v723_v36  ;;  %v780_v40 = vrot.slane %v723_v36, 1  ;;  %v923_v42 = vrot.slane %v723_v36, 2  ;;  %v1012_v51 = vrot.slane %v723_v36, 3  ;;  %v1100_v0 = vrot.slane %v723_v36, 4 }
 0x20c   :  { %v725_v38 = vpop.f32.mrf.mxu2 }
 0x20d   :  { %v2917_v39 = vadd.f32 %v725_v38, %v702_v37  ;;  %v1243_v37 = vld [vmem:[%s3426_s8 + $0x70] sm:$0xff] }
 0x20f   :  { %1804 = vmatmul.msk.f32.gmra.mxu2 %vm783_vm5, %v2917_v39  ;;  %v781_v41 = vrot.slane %v2917_v39, 1  ;;  %v2923_v43 = vrot.slane %v2917_v39, 2  ;;  %v2935_v48 = vrot.slane %v2917_v39, 3  ;;  %v1101_v62 = vrot.slane %v2917_v39, 4 }
 0x211   :  { %v782_v45 = vsel %vm779_vm6, %v780_v40, %v781_v41  ;;  %v925_v46 = vsel %vm922_vm7, %v923_v42, %v2923_v43  ;;  %v1014_v54 = vsel %vm1011_vm8, %v1012_v51, %v2935_v48  ;;  %v1102_v3 = vsel %vm601_vm1, %v1100_v0, %v1101_v62 }
 0x212   :  { %1797 = vmatmul.msk.f32.vlgmr.msrb.gmra.mxu3 %vm783_vm5, %v782_v45  ;;  %1800 = vmatmul.msk.f32.vlgmr.msrb.gmra.mxu1 %vm783_vm5, %v782_v45 }
 0x213   :  { %1833 = vmatmul.msk.f32.vlgmr.msra.gmra.mxu0 %vm783_vm5, %v925_v46  ;;  %1865 = vmatpush.msk.msrb.mxu3 %vm788_vm3, %v1861_v44  ;;  %v1241_v44 = vld [vmem:[%s3426_s8 + $0x60] sm:$0xff] }
 0x214   :  { %1895 = vmatpush.msk.msrb.mxu1 %vm788_vm3, %v1891_v47  ;;  %v1240_v47 = vld [vmem:[%s3426_s8 + $0x58] sm:$0xff] }
 0x215   :  { %1053 = vmatpush.msrb.mxu3 %v1859_v49  ;;  %v1238_v49 = vld [vmem:[%s3426_s8 + $0x48] sm:$0xff] }
 0x216   :  { %1141 = vmatpush.msrb.mxu1 %v1889_v50 }
 0x217   :  { %1863 = vmatmul.msk.f32.vlgmr.msrb.gmra.mxu2 %vm783_vm5, %v1014_v54  ;;  %1054 = vmatpush.msrb.mxu3 %v1857_v52 }
 0x218   :  { %1142 = vmatpush.msrb.mxu1 %v1887_v53  ;;  %v1237_v53 = vld [vmem:[%s3426_s8 + $0x40] sm:$0xff] }
 0x219   :  { %1055 = vmatpush.msrb.mxu3 %v1855_v55 }
 0x21a   :  { %1798 = vmatmul.msk.f32.gmra.mxu3 %vm783_vm5, %v781_v41  ;;  %1801 = vmatmul.msk.f32.gmra.mxu1 %vm783_vm5, %v781_v41  ;;  %v1242_v41 = vld [vmem:[%s3426_s8 + $0x68] sm:$0xff] }
 0x21b   :  { %1834 = vmatmul.msk.f32.gmra.mxu0 %vm783_vm5, %v2923_v43  ;;  %1143 = vmatpush.msrb.mxu1 %v1885_v56 }
 0x21c   :  { %1056 = vmatpush.msrb.mxu3 %v1853_v57  ;;  %v1235_v57 = vld [vmem:[%s3426_s8 + $0x30] sm:$0xff] }
 0x21d   :  { %1144 = vmatpush.msrb.mxu1 %v1883_v58 }
 0x21e   :  { %1057 = vmatpush.msrb.mxu3 %v1851_v59  ;;  %v1234_v59 = vld [vmem:[%s3426_s8 + $0x28] sm:$0xff] }
 0x21f   :  { %1864 = vmatmul.msk.f32.gmra.mxu2 %vm783_vm5, %v2935_v48  ;;  %1145 = vmatpush.msrb.mxu1 %v1881_v60 }
 0x220   :  { %1058 = vmatpush.msrb.mxu3 %v1849_v61 }
 0x221   :  { %1146 = vmatpush.msrb.mxu1 %v1879_v63 }
 0x222   :  { %1806 = vmatmul.msk.f32.vlgmr.msra.gmra.mxu3 %vm783_vm5, %v723_v36  ;;  %1836 = vmatmul.msk.f32.vlgmr.msra.gmra.mxu1 %vm783_vm5, %v925_v46  ;;  %v1244_v36 = vld [vmem:[%s3426_s8 + $0x78] sm:$0xff]  ;;  %v1177_v46 = vld [vmem:[%s3425_s7] sm:$0x3f] }
 0x223   :  { %1893 = vmatmul.msk.f32.vlgmr.msrb.gmra.mxu0 %vm783_vm5, %v1102_v3  ;;  %1059 = vmatpush.msrb.mxu3 %v1847_v1  ;;  %v1166_v1 = vperm.slane %v1163_v27, 1  ;;  %v1303_v27 = vld [vmem:[%s3427_s9 + $0x38] sm:$0xff] }
 0x224   :  { %1147 = vmatpush.msrb.mxu1 %v1877_v2 }
 0x225   :  { %1060 = vmatpush.msrb.mxu3 %v1845_v4 }
 0x226   :  { %1148 = vmatpush.msrb.mxu1 %v1875_v5  ;;  %v1231_v5 = vld [vmem:[%s3426_s8 + $0x10] sm:$0xff] }
 0x227   :  { %1061 = vmatpush.msrb.mxu3 %v1843_v6 }
 0x228   :  { %1149 = vmatpush.msrb.mxu1 %v1873_v7 }
 0x229   :  { %1062 = vmatpush.msrb.mxu3 %v1841_v8  ;;  %v1230_v8 = vld [vmem:[%s3426_s8 + $0x8] sm:$0xff] }
 0x22a   :  { %1807 = vmatmul.msk.f32.gmra.mxu3 %vm783_vm5, %v2917_v39  ;;  %1837 = vmatmul.msk.f32.gmra.mxu1 %vm783_vm5, %v2923_v43 }
 0x22b   :  { %1894 = vmatmul.msk.f32.gmra.mxu0 %vm783_vm5, %v1101_v62  ;;  %1150 = vmatpush.msrb.mxu1 %v1871_v9 }
 0x22c   :  { %1063 = vmatpush.msrb.mxu3 %v1839_v10  ;;  %v1229_v10 = vld [vmem:[%s3426_s8] sm:$0xff] }
 0x22d   :  { %1151 = vmatpush.msrb.mxu1 %v1869_v11 }
 0x22e   :  { %1255 = vmatpush.msra.mxu3 %v1244_v36  ;;  %v1908_v36 = vld [vmem:[%s3427_s9 + $0x80] sm:$0xff] }
 0x230   :  { %1256 = vmatpush.msra.mxu3 %v1243_v37  ;;  %v1300_v37 = vld [vmem:[%s3427_s9 + $0x20] sm:$0xff] }
 0x232   :  { %1866 = vmatmul.msk.f32.vlgmr.msrb.gmra.mxu3 %vm783_vm5, %v1014_v54  ;;  %1896 = vmatmul.msk.f32.vlgmr.msrb.gmra.mxu1 %vm783_vm5, %v1102_v3  ;;  %v1236_v54 = vld [vmem:[%s3426_s8 + $0x38] sm:$0xff] }
 0x233   :  { %1257 = vmatpush.msra.mxu3 %v1242_v41  ;;  %v1232_v3 = vld [vmem:[%s3426_s8 + $0x18] sm:$0xff]  ;;  %v1298_v41 = vld [vmem:[%s3427_s9 + $0x10] sm:$0xff] }
 0x235   :  { %1258 = vmatpush.msra.mxu3 %v1241_v44  ;;  %v1904_v44 = vld [vmem:[%s3427_s9 + $0x60] sm:$0xff] }
 0x237   :  { %1259 = vmatpush.msra.mxu3 %v1240_v47 }
 0x23a   :  { %1867 = vmatmul.msk.f32.gmra.mxu3 %vm783_vm5, %v2935_v48  ;;  %1897 = vmatmul.msk.f32.gmra.mxu1 %vm783_vm5, %v1101_v62  ;;  %v1239_v48 = vld [vmem:[%s3426_s8 + $0x50] sm:$0xff]  ;;  %v1233_v62 = vld [vmem:[%s3426_s8 + $0x20] sm:$0xff] }
 0x23b   :  { %1260 = vmatpush.msra.mxu3 %v1239_v48  ;;  %v1927_v48 = vld [vmem:[%s3427_s9 + $0x110] sm:$0xff] }
 0x23d   :  { %1261 = vmatpush.msra.mxu3 %v1238_v49  ;;  %v1941_v49 = vld [vmem:[%s3427_s9 + $0x178] sm:$0xff] }
 0x23f   :  { %1262 = vmatpush.msra.mxu3 %v1237_v53  ;;  %v1940_v53 = vld [vmem:[%s3427_s9 + $0x170] sm:$0xff] }
 0x241   :  { %1263 = vmatpush.msra.mxu3 %v1236_v54  ;;  %v1951_v54 = vld [vmem:[%s3427_s9 + $0x1c0] sm:$0xff] }
 0x243   :  { %1264 = vmatpush.msra.mxu3 %v1235_v57  ;;  %v1939_v57 = vld [vmem:[%s3427_s9 + $0x168] sm:$0xff] }
 0x245   :  { %1265 = vmatpush.msra.mxu3 %v1234_v59  ;;  %v1964_v59 = vld [vmem:[%s3427_s9 + $0x220] sm:$0xff] }
 0x247   :  { %1266 = vmatpush.msra.mxu3 %v1233_v62  ;;  %v1949_v62 = vld [vmem:[%s3427_s9 + $0x1b0] sm:$0xff] }
 0x249   :  { %1267 = vmatpush.msra.mxu3 %v1232_v3  ;;  %v1937_v3 = vld [vmem:[%s3427_s9 + $0x158] sm:$0xff] }
 0x24b   :  { %1268 = vmatpush.msra.mxu3 %v1231_v5  ;;  %v1921_v5 = vld [vmem:[%s3427_s9 + $0xe0] sm:$0xff] }
 0x24d   :  { %1269 = vmatpush.msra.mxu3 %v1230_v8  ;;  %v1920_v8 = vld [vmem:[%s3427_s9 + $0xd8] sm:$0xff] }
 0x24f   :  { %1270 = vmatpush.msra.mxu3 %v1229_v10  ;;  %v1935_v10 = vld [vmem:[%s3427_s9 + $0x148] sm:$0xff] }
 0x28a   :  { %v868_v12 = vpop.f32.mrf.mxu2 }
 0x28f   :  { %v835_v13 = vpop.f32.mrf.mxu1 }
 0x290   :  { %v953_v14 = vpop.f32.mrf.mxu0 }
 0x292   :  { %v871_v15 = vpop.f32.mrf.mxu2 }
 0x295   :  { %v812_v16 = vpop.f32.mrf.mxu3 }
 0x296   :  { %v869_v20 = vadd.f32 %v868_v12, %v812_v16  ;;  %v1250_v12 = vld [vmem:[%s3426_s8 + $0xa8] sm:$0xff] }
 0x297   :  { %v838_v17 = vpop.f32.mrf.mxu1  ;;  %1285 = vmatpush.msrb.mxu3 %v1250_v12  ;;  %v1246_v16 = vld [vmem:[%s3426_s8 + $0x88] sm:$0xff] }
 0x298   :  { %v956_v18 = vpop.f32.mrf.mxu0  ;;  %v982_v24 = vadd.f32 %v953_v14, %v869_v20  ;;  %v1248_v14 = vld [vmem:[%s3426_s8 + $0x98] sm:$0xff]  ;;  %v1914_v20 = vld [vmem:[%s3427_s9 + $0xb0] sm:$0xff]  ;;  %v1961_v12 = vld [vmem:[%s3427_s9 + $0x208] sm:$0xff] }
 0x29a   :  { %v1042_v19 = vpop.f32.mrf.mxu2 }
 0x29b   :  { %v1071_v29 = vadd.f32 %v1042_v19, %v982_v24  ;;  %v1307_v19 = vld [vmem:[%s3427_s9 + $0x58] sm:$0xff]  ;;  %v1912_v24 = vld [vmem:[%s3427_s9 + $0xa0] sm:$0xff] }
 0x29c   :  { %1315 = vmatpush.msra.mxu1 %v1307_v19  ;;  %v1943_v19 = vld [vmem:[%s3427_s9 + $0x180] sm:$0xff] }
 0x29d   :  { %v815_v21 = vpop.f32.mrf.mxu3 }
 0x29e   :  { %v872_v22 = vadd.f32 %v871_v15, %v815_v21  ;;  %v1247_v15 = vld [vmem:[%s3426_s8 + $0x90] sm:$0xff] }
 0x29f   :  { %v976_v25 = vpop.f32.mrf.mxu1  ;;  %v1306_v21 = vld [vmem:[%s3427_s9 + $0x50] sm:$0xff] }
 0x2a0   :  { %v1130_v23 = vpop.f32.mrf.mxu0  ;;  %v984_v26 = vadd.f32 %v956_v18, %v872_v22  ;;  %v1915_v18 = vld [vmem:[%s3427_s9 + $0xb8] sm:$0xff]  ;;  %v1913_v22 = vld [vmem:[%s3427_s9 + $0xa8] sm:$0xff]  ;;  %1316 = vmatpush.msra.mxu1 %v1306_v21 }
 0x2a1   :  { %v1159_v31 = vadd.f32 %v1130_v23, %v1071_v29  ;;  %v1305_v23 = vld [vmem:[%s3427_s9 + $0x48] sm:$0xff]  ;;  %v1959_v21 = vld [vmem:[%s3427_s9 + $0x1f8] sm:$0xff] }
 0x2a2   :  { %v1045_v28 = vpop.f32.mrf.mxu2  ;;  %1317 = vmatpush.msra.mxu1 %v1305_v23  ;;  %v1958_v23 = vld [vmem:[%s3427_s9 + $0x1f0] sm:$0xff] }
 0x2a3   :  { %v1073_v33 = vadd.f32 %v1045_v28, %v984_v26  ;;  %v1169_v38 = vadd.f32 %v1165_v32, %v1159_v31  ;;  %v1911_v26 = vld [vmem:[%s3427_s9 + $0x98] sm:$0xff] }
 0x2a4   :  { %v1954_v28 = vld [vmem:[%s3427_s9 + $0x1d8] sm:$0xff] }
 0x2a5   :  { %v891_v30 = vpop.f32.mrf.mxu3  ;;  %v1173_v45 = vmax.f32 %v1169_v38, 0.0  ;;  %v1928_v31 = vld [vmem:[%s3427_s9 + $0x118] sm:$0xff] }
 0x2a6   :  { %v892_v50 = vadd.f32 %v891_v30, %v835_v13  ;;  %v1249_v13 = vld [vmem:[%s3426_s8 + $0xa0] sm:$0xff]  ;;  %v1910_v30 = vld [vmem:[%s3427_s9 + $0x90] sm:$0xff]  ;;  %1389 = vmatpush.msra.mxu0 %v1928_v31  ;;  %v1907_v38 = vld [vmem:[%s3427_s9 + $0x78] sm:$0xff] }
 0x2a7   :  { %v979_v39 = vpop.f32.mrf.mxu1  ;;  %1286 = vmatpush.msrb.mxu3 %v1249_v13  ;;  %v1960_v13 = vld [vmem:[%s3427_s9 + $0x200] sm:$0xff]  ;;  %v1529_v31 = vld [vmem:[%s3429_s11 + $0x58] sm:$0xff] }
 0x2a8   :  { %v1133_v34 = vpop.f32.mrf.mxu0  ;;  %v983_v56 = vadd.f32 %v976_v25, %v892_v50  ;;  %v1304_v25 = vld [vmem:[%s3427_s9 + $0x40] sm:$0xff]  ;;  %v1952_v50 = vld [vmem:[%s3427_s9 + $0x1c8] sm:$0xff]  ;;  %1390 = vmatpush.msra.mxu0 %v1927_v48  ;;  %v1520_v48 = vld [vmem:[%s3429_s11 + $0x10] sm:$0xff] }
 0x2a9   :  { %v1161_v35 = vadd.f32 %v1133_v34, %v1073_v33  ;;  %1287 = vmatpush.msrb.mxu3 %v1248_v14  ;;  %1318 = vmatpush.msra.mxu1 %v1304_v25  ;;  %v1953_v33 = vld [vmem:[%s3427_s9 + $0x1d0] sm:$0xff]  ;;  %v1909_v34 = vld [vmem:[%s3427_s9 + $0x88] sm:$0xff] }
 0x2aa   :  { %v1919_v14 = vld [vmem:[%s3427_s9 + $0xd0] sm:$0xff]  ;;  %v1957_v25 = vld [vmem:[%s3427_s9 + $0x1e8] sm:$0xff] }
 0x2ab   :  { %v1171_v40 = vadd.f32 %v1165_v32, %v1161_v35  ;;  %1288 = vmatpush.msrb.mxu3 %v1247_v15  ;;  %v1302_v32 = vld [vmem:[%s3427_s9 + $0x30] sm:$0xff]  ;;  %1319 = vmatpush.msra.mxu1 %v1303_v27  ;;  %v1301_v35 = vld [vmem:[%s3427_s9 + $0x28] sm:$0xff]  ;;  %v1934_v15 = vld [vmem:[%s3427_s9 + $0x140] sm:$0xff] }
 0x2ac   :  { %v1930_v27 = vld [vmem:[%s3427_s9 + $0x120] sm:$0xff] }
 0x2ad   :  { %v1175_v42 = vmax.f32 %v1171_v40, 0.0  ;;  %v894_v43 = vpop.f32.mrf.mxu3  ;;  %1289 = vmatpush.msrb.mxu3 %v1246_v16  ;;  %1320 = vmatpush.msra.mxu1 %v1302_v32  ;;  %v1906_v40 = vld [vmem:[%s3427_s9 + $0x70] sm:$0xff]  ;;  %v1944_v16 = vld [vmem:[%s3427_s9 + $0x188] sm:$0xff] }
 0x2ae   :  { %v895_v55 = vadd.f32 %v894_v43, %v838_v17  ;;  %v1245_v17 = vld [vmem:[%s3426_s8 + $0x80] sm:$0xff]  ;;  %v1297_v43 = vld [vmem:[%s3427_s9 + $0x8] sm:$0xff]  ;;  %v1528_v32 = vld [vmem:[%s3429_s11 + $0x50] sm:$0xff] }
 0x2af   :  { %1898 = vmatpush.msk.msra.mxu2 %vm1182_vm9, %v1175_v42  ;;  %v1153_v51 = vpop.f32.mrf.mxu1  ;;  %1290 = vmatpush.msrb.mxu3 %v1245_v17  ;;  %v1905_v42 = vld [vmem:[%s3427_s9 + $0x68] sm:$0xff] }
 0x2b0   :  { %v985_v60 = vadd.f32 %v979_v39, %v895_v55  ;;  %1321 = vmatpush.msra.mxu1 %v1301_v35  ;;  %v1299_v39 = vld [vmem:[%s3427_s9 + $0x18] sm:$0xff]  ;;  %v1965_v55 = vld [vmem:[%s3427_s9 + $0x228] sm:$0xff] }
 0x2b1   :  { %1204 = vmatpush.msra.mxu2 %v1173_v45  ;;  %v1967_v45 = vld [vmem:[%s3427_s9 + $0x238] sm:$0xff]  ;;  %v1918_v17 = vld [vmem:[%s3427_s9 + $0xc8] sm:$0xff] }
 0x2b2   :  { %1899 = vmatmul.msk.f32.vlgmr.msra.gmra.mxu2 %vm1178_vm10, %v1177_v46  ;;  %1322 = vmatpush.msra.mxu1 %v1300_v37 }
 0x2b4   :  { %1323 = vmatpush.msra.mxu1 %v1299_v39 }
 0x2b5   :  { %v1065_v52 = vpop.f32.mrf.mxu3 }
 0x2b6   :  { %v1072_v58 = vadd.f32 %v1065_v52, %v983_v56  ;;  %1324 = vmatpush.msra.mxu1 %v1298_v41  ;;  %v1926_v52 = vld [vmem:[%s3427_s9 + $0x108] sm:$0xff]  ;;  %v1925_v56 = vld [vmem:[%s3427_s9 + $0x100] sm:$0xff] }
 0x2b7   :  { %v1156_v2 = vpop.f32.mrf.mxu1  ;;  %1391 = vmatpush.msra.mxu0 %v1926_v52  ;;  %v1568_v52 = vld [vmem:[%s3431_s13 + $0x48] sm:$0xff] }
 0x2b8   :  { %v1160_v63 = vadd.f32 %v1153_v51, %v1072_v58  ;;  %1325 = vmatpush.msra.mxu1 %v1297_v43  ;;  %v1966_v51 = vld [vmem:[%s3427_s9 + $0x230] sm:$0xff]  ;;  %v1950_v58 = vld [vmem:[%s3427_s9 + $0x1b8] sm:$0xff] }
 0x2b9   :  { %1392 = vmatpush.msra.mxu0 %v1925_v56  ;;  %v1525_v43 = vld [vmem:[%s3429_s11 + $0x38] sm:$0xff]  ;;  %v1564_v56 = vld [vmem:[%s3431_s13 + $0x28] sm:$0xff] }
 0x2ba   :  { %v1170_v7 = vadd.f32 %v1166_v1, %v1160_v63  ;;  %v1963_v63 = vld [vmem:[%s3427_s9 + $0x218] sm:$0xff] }
 0x2bc   :  { %v1174_v11 = vmax.f32 %v1170_v7, 0.0  ;;  %v1946_v7 = vld [vmem:[%s3427_s9 + $0x198] sm:$0xff] }
 0x2bd   :  { %v1068_v61 = vpop.f32.mrf.mxu3 }
 0x2be   :  { %v1074_v0 = vadd.f32 %v1068_v61, %v985_v60  ;;  %v1924_v60 = vld [vmem:[%s3427_s9 + $0xf8] sm:$0xff]  ;;  %v1938_v61 = vld [vmem:[%s3427_s9 + $0x160] sm:$0xff] }
 0x2bf   :  { %1393 = vmatpush.msra.mxu0 %v1924_v60  ;;  %v1295_v60 = vld [vmem:[%s3428_s10] sm:$0x1] }
 0x2c0   :  { %v1162_v4 = vadd.f32 %v1156_v2, %v1074_v0  ;;  %v1923_v0 = vld [vmem:[%s3427_s9 + $0xf0] sm:$0xff]  ;;  %v1922_v2 = vld [vmem:[%s3427_s9 + $0xe8] sm:$0xff] }
 0x2c1   :  { %1394 = vmatpush.msra.mxu0 %v1923_v0 }
 0x2c2   :  { %v1172_v6 = vadd.f32 %v1166_v1, %v1162_v4  ;;  %v1948_v1 = vld [vmem:[%s3427_s9 + $0x1a8] sm:$0xff]  ;;  %v1947_v4 = vld [vmem:[%s3427_s9 + $0x1a0] sm:$0xff] }
 0x2c3   :  { %1395 = vmatpush.msra.mxu0 %v1922_v2 }
 0x2c4   :  { %v1176_v9 = vmax.f32 %v1172_v6, 0.0  ;;  %v1936_v6 = vld [vmem:[%s3427_s9 + $0x150] sm:$0xff] }
 0x2c5   :  { %1396 = vmatpush.msra.mxu0 %v1921_v5 }
 0x2c6   :  { %1900 = vmatpush.msk.msrb.mxu2 %vm1182_vm9, %v1176_v9  ;;  %v1962_v9 = vld [vmem:[%s3427_s9 + $0x210] sm:$0xff] }
 0x2c7   :  { %1397 = vmatpush.msra.mxu0 %v1920_v8 }
 0x2c8   :  { %1224 = vmatpush.msrb.mxu2 %v1174_v11  ;;  %v1945_v11 = vld [vmem:[%s3427_s9 + $0x190] sm:$0xff] }
 0x2c9   :  { %1901 = vmatmul.msk.f32.vlgmr.msrb.gmra.mxu2 %vm1178_vm10, %v1177_v46  ;;  %v1296_v46 = vld [vmem:[%s3427_s9] sm:$0xff]  ;;  %1398 = vmatpush.msra.mxu0 %v1919_v14 }
 0x2ca   :  { %1352 = vmatpush.msra.mxu2 %v1915_v18  ;;  %1326 = vmatpush.msra.mxu1 %v1296_v46  ;;  %v1933_v18 = vld [vmem:[%s3427_s9 + $0x138] sm:$0xff]  ;;  %v1522_v46 = vld [vmem:[%s3429_s11 + $0x20] sm:$0xff] }
 0x2cb   :  { %1399 = vmatpush.msra.mxu0 %v1918_v17 }
 0x2cc   :  { %1353 = vmatpush.msra.mxu2 %v1914_v20  ;;  %1426 = vmatpush.msrb.mxu1 %v1941_v49  ;;  %v1917_v20 = vld [vmem:[%s3427_s9 + $0xc0] sm:$0xff]  ;;  %v1519_v49 = vld [vmem:[%s3429_s11 + $0x8] sm:$0xff] }
 0x2cd   :  { %1400 = vmatpush.msra.mxu0 %v1917_v20 }
 0x2ce   :  { %1354 = vmatpush.msra.mxu2 %v1913_v22  ;;  %1427 = vmatpush.msrb.mxu1 %v1940_v53  ;;  %v1932_v22 = vld [vmem:[%s3427_s9 + $0x130] sm:$0xff]  ;;  %v1567_v53 = vld [vmem:[%s3431_s13 + $0x40] sm:$0xff] }
 0x2d0   :  { %1355 = vmatpush.msra.mxu2 %v1912_v24  ;;  %1428 = vmatpush.msrb.mxu1 %v1939_v57  ;;  %v1931_v24 = vld [vmem:[%s3427_s9 + $0x128] sm:$0xff]  ;;  %v1563_v57 = vld [vmem:[%s3431_s13 + $0x20] sm:$0xff] }
 0x2d2   :  { %1356 = vmatpush.msra.mxu2 %v1911_v26  ;;  %1429 = vmatpush.msrb.mxu1 %v1938_v61  ;;  %v1956_v26 = vld [vmem:[%s3427_s9 + $0x1e0] sm:$0xff]  ;;  %s1619_s9 = sshll.u32 %s3433_s15, 4  ;;  %s1620_s9 = int_to_ptr.hbm [resolvable:$true] %s1619_s9 }
 0x2d4   :  { %1357 = vmatpush.msra.mxu2 %v1910_v30  ;;  %1430 = vmatpush.msrb.mxu1 %v1937_v3  ;;  %v1530_v30 = vld [vmem:[%s3429_s11 + $0x60] sm:$0xff] }
 0x2d6   :  { %1358 = vmatpush.msra.mxu2 %v1909_v34  ;;  %1431 = vmatpush.msrb.mxu1 %v1936_v6 }
 0x2d8   :  { %1359 = vmatpush.msra.mxu2 %v1908_v36  ;;  %1432 = vmatpush.msrb.mxu1 %v1935_v10  ;;  %v1560_v10 = vld [vmem:[%s3431_s13 + $0x8] sm:$0xff] }
 0x2da   :  { %1360 = vmatpush.msra.mxu2 %v1907_v38  ;;  %1433 = vmatpush.msrb.mxu1 %v1934_v15 }
 0x2dc   :  { %1361 = vmatpush.msra.mxu2 %v1906_v40  ;;  %1434 = vmatpush.msrb.mxu1 %v1933_v18 }
 0x2de   :  { %1362 = vmatpush.msra.mxu2 %v1905_v42  ;;  %1435 = vmatpush.msrb.mxu1 %v1932_v22  ;;  %v1526_v42 = vld [vmem:[%s3429_s11 + $0x40] sm:$0xff] }
 0x2e0   :  { %1363 = vmatpush.msra.mxu2 %v1904_v44  ;;  %1436 = vmatpush.msrb.mxu1 %v1931_v24  ;;  %v1524_v44 = vld [vmem:[%s3429_s11 + $0x30] sm:$0xff] }
 0x2e2   :  { %1500 = vmatpush.msrb.mxu2 %v1967_v45  ;;  %1437 = vmatpush.msrb.mxu1 %v1930_v27  ;;  %v1523_v45 = vld [vmem:[%s3429_s11 + $0x28] sm:$0xff] }
 0x2e4   :  { %1501 = vmatpush.msrb.mxu2 %v1966_v51  ;;  %v1569_v51 = vld [vmem:[%s3431_s13 + $0x50] sm:$0xf] }
 0x2e6   :  { %1502 = vmatpush.msrb.mxu2 %v1965_v55  ;;  %v1565_v55 = vld [vmem:[%s3431_s13 + $0x30] sm:$0xff] }
 0x2e8   :  { %1503 = vmatpush.msrb.mxu2 %v1964_v59 }
 0x2ea   :  { %1504 = vmatpush.msrb.mxu2 %v1963_v63 }
 0x2ec   :  { %1505 = vmatpush.msrb.mxu2 %v1962_v9  ;;  %v1561_v9 = vld [vmem:[%s3431_s13 + $0x10] sm:$0xff] }
 0x2ee   :  { %1506 = vmatpush.msrb.mxu2 %v1961_v12  ;;  %v1533_v12 = vld [vmem:[%s3430_s12] sm:$0x1]  ;;  %s1999_s12 = smov [#allocation2]  }
 0x2f0   :  { %1507 = vmatpush.msrb.mxu2 %v1960_v13 }
 0x2f2   :  { %1508 = vmatpush.msrb.mxu2 %v1959_v21 }
 0x2f4   :  { %1509 = vmatpush.msrb.mxu2 %v1958_v23 }
 0x2f6   :  { %1510 = vmatpush.msrb.mxu2 %v1957_v25 }
 0x2f8   :  { %1511 = vmatpush.msrb.mxu2 %v1956_v26 }
 0x335   :  { %v1206_v29 = vpop.f32.mrf.mxu2 }
 0x336   :  { %1271 = vmatmul.f32.vlgmr.msra.gmra.mxu3 %v1206_v29  ;;  %v1531_v29 = vld [vmem:[%s3429_s11 + $0x68] sm:$0xff] }
 0x337   :  { %1463 = vmatpush.msra.mxu3 %v1954_v28  ;;  %v1532_v28 = vld [vmem:[%s3429_s11 + $0x70] sm:$0xff] }
 0x338   :  { %1539 = vmatpush.msrb.mxu0 %v1532_v28 }
 0x339   :  { %1464 = vmatpush.msra.mxu3 %v1953_v33  ;;  %v1527_v33 = vld [vmem:[%s3429_s11 + $0x48] sm:$0xff] }
 0x33a   :  { %1540 = vmatpush.msrb.mxu0 %v1531_v29 }
 0x33b   :  { %1465 = vmatpush.msra.mxu3 %v1952_v50  ;;  %v1518_v50 = vld [vmem:[%s3429_s11] sm:$0xff] }
 0x33c   :  { %1541 = vmatpush.msrb.mxu0 %v1530_v30 }
 0x33d   :  { %1466 = vmatpush.msra.mxu3 %v1951_v54  ;;  %v1566_v54 = vld [vmem:[%s3431_s13 + $0x38] sm:$0xff] }
 0x33e   :  { %1542 = vmatpush.msrb.mxu0 %v1529_v31 }
 0x33f   :  { %1467 = vmatpush.msra.mxu3 %v1950_v58  ;;  %v1562_v58 = vld [vmem:[%s3431_s13 + $0x18] sm:$0xff] }
 0x340   :  { %1543 = vmatpush.msrb.mxu0 %v1528_v32 }
 0x341   :  { %1468 = vmatpush.msra.mxu3 %v1949_v62 }
 0x342   :  { %1544 = vmatpush.msrb.mxu0 %v1527_v33 }
 0x343   :  { %1469 = vmatpush.msra.mxu3 %v1948_v1 }
 0x344   :  { %1545 = vmatpush.msrb.mxu0 %v1526_v42 }
 0x345   :  { %1470 = vmatpush.msra.mxu3 %v1947_v4 }
 0x346   :  { %1546 = vmatpush.msrb.mxu0 %v1525_v43 }
 0x347   :  { %1471 = vmatpush.msra.mxu3 %v1946_v7 }
 0x348   :  { %1547 = vmatpush.msrb.mxu0 %v1524_v44 }
 0x349   :  { %1472 = vmatpush.msra.mxu3 %v1945_v11  ;;  %v1559_v11 = vld [vmem:[%s3431_s13] sm:$0xff]  ;;  %s1617_s13 = sshll.u32 %s1999_s12, 4  ;;  %s1618_s13 = int_to_ptr.vmem [resolvable:$true] %s1617_s13 }
 0x34a   :  { %1548 = vmatpush.msrb.mxu0 %v1523_v45 }
 0x34b   :  { %1473 = vmatpush.msra.mxu3 %v1944_v16  ;;  %v1598_v16 = vlaneseq }
 0x34c   :  { %v1226_v47 = vpop.f32.mrf.mxu2  ;;  %1549 = vmatpush.msrb.mxu0 %v1522_v46 }
 0x34d   :  { %1902 = vmatmul.msk.f32.vlgmr.msrb.gmra.mxu3 %vm1251_vm11, %v1226_v47  ;;  %v1521_v47 = vld [vmem:[%s3429_s11 + $0x18] sm:$0xff]  ;;  %v1599_v17 = vand.u32 127, %v1598_v16 }
 0x34e   :  { %1474 = vmatpush.msra.mxu3 %v1943_v19  ;;  %1550 = vmatpush.msrb.mxu0 %v1521_v47  ;;  %v1570_v19 = vld [vmem:[%s3432_s14] sm:$0x1] }
 0x34f   :  { %v1601_v18 = vand.u32 1, %v1599_v17  ;;  %vm1600_vm14 = vcmp.lt.s32.totalorder %v1599_v17, 9 }
 0x350   :  { %1551 = vmatpush.msrb.mxu0 %v1520_v48 }
 0x351   :  { %vm1602_vm15 = vcmp.eq.s32.totalorder %v1601_v18, 0 }
 0x352   :  { %1552 = vmatpush.msrb.mxu0 %v1519_v49 }
 0x354   :  { %1553 = vmatpush.msrb.mxu0 %v1518_v50 }
 0x3b9   :  { %v1272_v34 = vpop.f32.mrf.mxu3 }
 0x3d0   :  { %v1292_v35 = vpop.f32.mrf.mxu3 }
 0x3d1   :  { %v1293_v36 = vadd.f32 %v1292_v35, %v1272_v34 }
 0x3d3   :  { %v1345_v37 = vrot.slane %v1293_v36, 1  ;;  %1903 = vmatmul.msk.f32.vlgmr.msra.gmra.mxu1 %vm108_vm0, %v1293_v36  ;;  %v1456_v38 = vrot.slane %v1293_v36, 4  ;;  %v1382_v39 = vrot.slane %v1293_v36, 2  ;;  %v1419_v40 = vrot.slane %v1293_v36, 3 }
 0x3d4   :  { %v1493_v41 = vrot.slane %v1293_v36, 5  ;;  %1970 = vmatpush.msk.msra.mxu1 %vm601_vm1, %v1569_v51  ;;  %vm1605_vm1 = vcmask 73728  }
 0x3d5   :  { %1916 = vmatmul.msk.f32.vlgmr.msra.gmra.mxu2 %vm108_vm0, %v1345_v37  ;;  %1955 = vmatmul.msk.f32.vlgmr.msra.gmra.mxu3 %vm108_vm0, %v1456_v38 }
 0x3d6   :  { %1929 = vmatmul.msk.f32.vlgmr.msra.gmra.mxu0 %vm108_vm0, %v1382_v39  ;;  %1584 = vmatpush.msra.mxu1 %v1568_v52 }
 0x3d8   :  { %1585 = vmatpush.msra.mxu1 %v1567_v53 }
 0x3da   :  { %1586 = vmatpush.msra.mxu1 %v1566_v54 }
 0x3db   :  { %1942 = vmatmul.msk.f32.vlgmr.msrb.gmra.mxu1 %vm108_vm0, %v1419_v40 }
 0x3dc   :  { %1587 = vmatpush.msra.mxu1 %v1565_v55 }
 0x3dd   :  { %1968 = vmatmul.msk.f32.vlgmr.msrb.gmra.mxu2 %vm108_vm0, %v1493_v41  ;;  %vm1603_vm0 = vmand %vm1600_vm14, %vm1602_vm15 }
 0x3de   :  { %1588 = vmatpush.msra.mxu1 %v1564_v56 }
 0x3e0   :  { %1589 = vmatpush.msra.mxu1 %v1563_v57 }
 0x3e2   :  { %1590 = vmatpush.msra.mxu1 %v1562_v58 }
 0x3e4   :  { %1591 = vmatpush.msra.mxu1 %v1561_v9 }
 0x3e6   :  { %1592 = vmatpush.msra.mxu1 %v1560_v10 }
 0x3e8   :  { %1593 = vmatpush.msra.mxu1 %v1559_v11 }
 0x450   :  { %v1328_v59 = vpop.f32.mrf.mxu1 }
 0x451   :  { %v1331_v61 = vadd.f32 %v1328_v59, %v1295_v60 }
 0x453   :  { %v1402_v0 = vpop.f32.mrf.mxu0 }
 0x458   :  { %v1365_v62 = vpop.f32.mrf.mxu2  ;;  %v1439_v2 = vpop.f32.mrf.mxu1 }
 0x459   :  { %v1368_v63 = vadd.f32 %v1365_v62, %v1331_v61  ;;  %v1476_v4 = vpop.f32.mrf.mxu3 }
 0x45b   :  { %v1405_v1 = vadd.f32 %v1402_v0, %v1368_v63 }
 0x45d   :  { %v1442_v3 = vadd.f32 %v1439_v2, %v1405_v1 }
 0x45f   :  { %v1479_v5 = vadd.f32 %v1476_v4, %v1442_v3 }
 0x460   :  { %v1513_v6 = vpop.f32.mrf.mxu2 }
 0x461   :  { %v1516_v7 = vadd.f32 %v1513_v6, %v1479_v5 }
 0x463   :  { %v1517_v8 = vmax.f32 %v1516_v7, 0.0 }
 0x465   :  { %1969 = vmatmul.msk.f32.vlgmr.msrb.gmra.mxu0 %vm1534_vm12, %v1517_v8 }
 0x4e2   :  { %v1555_v13 = vpop.f32.mrf.mxu0 }
 0x4e3   :  { %v1556_v14 = vadd.f32 %v1555_v13, %v1533_v12 }
 0x4e5   :  { %v1558_v15 = vmax.f32 %v1556_v14, 0.0 }
 0x4e7   :  { %1971 = vmatmul.msk.f32.vlgmr.msra.gmra.mxu1 %vm1571_vm13, %v1558_v15 }
 0x564   :  { %v1595_v20 = vpop.f32.mrf.mxu1 }
 0x565   :  { %v1596_v21 = vadd.f32 %v1595_v20, %v1570_v19 }
 0x567   :  { %v1604_v22 = vsel %vm1603_vm0, %v1596_v21, 0.0 }
 0x568   :  { %v1606_v23 = vsel %vm1605_vm1, %v1604_v22, 0.0 }
 0x569   :  { %1607 = vadd.xlane.f32.xlu0 %v1606_v23 }
 0x5dc   :  { %v1608_v24 = vpop.xlane.xlu0 %1607 }
 0x5dd   :  { %v1609_v25 = vmul.f32 0.2, %v1608_v24 }
 0x5df   :  { %1611 = vst.msk [vmem:[#allocation2] sm:$0x1] %vm1610_vm2, %v1609_v25 }
 0x5e0   :  { %1622 = dma.vmem_to_hbm [thread:$0]  %s1618_s13, 16, %s1620_s9, [#allocation3]  }
 0x5e1   :  { %1997 = dma.done.wait [#allocation3], 16  }
 0x5e2   :  { %1998 = vsyncadd [#allocation3], 4294967280 }
 0x5e3   :  { %1627 = vsyncpa [#allocation3], 1 }

</bundles_post_ra>
